<compile_context>
chip_gen: v7x
topology: tpu7x:2x2x1
jax: 0.10.0
libtpu: 0.0.40
codegen_flags: <defaults>
</compile_context>

<pallas_src>
import jax
import jax.numpy as jnp
from jax.experimental import pallas as pl
from jax.experimental.pallas import tpu as pltpu

BN_EPS = 1e-5
LANE = 128
SUBLANE_BF16 = 16   # bf16 native vreg tile is (16, 128)


def _round_up(n, m):
    return ((n + m - 1) // m) * m


def _mlp_kernel(x_ref, w1_ref, s1_ref, w2_ref, s2_ref, w3_ref, b3_ref,
                alpha_ref, o_ref):
    # x arrives f32 (zero-padded rows/cols); cast to bf16 on the VPU.
    x = x_ref[...].astype(jnp.bfloat16)

    # ---- fc1 (+ folded bn1) + PReLU1 (dropout = identity in eval) ----
    h = jnp.dot(x, w1_ref[...], preferred_element_type=jnp.float32)
    h = h + s1_ref[...]
    h = jnp.where(h > 0, h, alpha_ref[0] * h)   # PReLU, f32 epilogue (v5e-safe)
    h = h.astype(jnp.bfloat16)

    # ---- fc2 (+ folded bn2) + PReLU2 (dropout = identity in eval) ----
    h = jnp.dot(h, w2_ref[...], preferred_element_type=jnp.float32)
    h = h + s2_ref[...]
    h = jnp.where(h > 0, h, alpha_ref[1] * h)
    h = h.astype(jnp.bfloat16)

    # ---- fc3 + sigmoid (output width padded to a 128-lane multiple) ----
    out = jnp.dot(h, w3_ref[...], preferred_element_type=jnp.float32) + b3_ref[...]
    o_ref[...] = jax.nn.sigmoid(out)


def prepare_params(p):
    """One-time transform: fold BN (+ linear bias) into weights (in f32), cast
    to bf16, pad K of fc1 and N of fc3 to lane-dense multiples of 128, pack the
    two PReLU slopes into one (2,) f32 array."""
    def fold(w, b, g, be, m, v):
        scale = g * jax.lax.rsqrt(v + BN_EPS)                 # (1, N), f32
        w_f = (w * scale).astype(jnp.bfloat16)                # fold in f32, then cast
        shift = ((b - m) * scale + be).astype(jnp.float32)    # (1, N)
        return w_f, shift

    w1, s1 = fold(p["w1"], p["b1"], p["g1"], p["be1"], p["m1"], p["v1"])
    w2, s2 = fold(p["w2"], p["b2"], p["g2"], p["be2"], p["m2"], p["v2"])

    inputsize = p["w1"].shape[0]
    k_pad = _round_up(inputsize, LANE)
    if k_pad != inputsize:                       # lane-dense K for the first matmul
        w1 = jnp.pad(w1, ((0, k_pad - inputsize), (0, 0)))

    num_classes = p["w3"].shape[1]
    n_out_pad = _round_up(num_classes, LANE)
    w3 = jnp.pad(p["w3"], ((0, 0), (0, n_out_pad - num_classes))).astype(jnp.bfloat16)
    b3 = jnp.pad(p["b3"], ((0, 0), (0, n_out_pad - num_classes))).astype(jnp.float32)

    alpha = jnp.concatenate(
        [p["a1"].reshape(-1), p["a2"].reshape(-1)]).astype(jnp.float32)  # (2,)

    return dict(w1=w1, s1=s1, w2=w2, s2=s2, w3=w3, b3=b3, alpha=alpha,
                num_classes=num_classes, inputsize=inputsize)


def baseline_model1_forward(x, prep, *, block_m=256):
    """x: (B, inputsize) float32. Returns (B, num_classes) float32.

    block_m: max batch tile (256 on v6e/v7x, prefer 128 on v5e). Weights stay
    single-buffered & resident in VMEM across grid steps; x/out tiles are
    double-buffered by Pallas.
    """
    B, inputsize = x.shape
    assert inputsize == prep["inputsize"]
    w1, s1, w2, s2, w3, b3, alpha = (prep["w1"], prep["s1"], prep["w2"],
                                     prep["s2"], prep["w3"], prep["b3"],
                                     prep["alpha"])
    num_classes = prep["num_classes"]
    k_pad = w1.shape[0]        # inputsize rounded up to 128
    h1 = w1.shape[1]           # 1024
    h2 = w2.shape[1]           # 512
    n_out = w3.shape[1]        # padded num_classes (multiple of 128)

    # --- batch tiling: minimize padding, multiple of 16 (bf16 sublanes), and
    # give v7x's second TensorCore work when the batch is big enough.
    n_steps = pl.cdiv(B, block_m)
    if n_steps == 1 and B >= 2 * SUBLANE_BF16:
        n_steps = 2                               # shard 'parallel' axis over 2 TCs
    tm = _round_up(pl.cdiv(B, n_steps), SUBLANE_BF16)
    b_pad = _round_up(B, tm)
    grid = (b_pad // tm,)

    # Single wrapper pad covering batch rows and the lane-dense K columns.
    if b_pad != B or k_pad != inputsize:
        x = jnp.pad(x, ((0, b_pad - B), (0, k_pad - inputsize)))

    # VMEM budget from actual footprint (weights single-buffered, x/out double-
    # buffered f32 tiles) + slack; floored at 16 MiB, capped at 48 MiB (safe on
    # v7x's 64 MiB physical VMEM, well under v5e/v6e's 128 MiB).
    weight_bytes = ((w1.size + w2.size + w3.size) * 2
                    + (s1.size + s2.size + b3.size) * 4)
    act_bytes = 2 * (tm * k_pad * 4 + tm * n_out * 4)
    vmem_limit = int(min(48 * 1024 * 1024,
                         max(16 * 1024 * 1024,
                             weight_bytes + act_bytes + 4 * 1024 * 1024)))

    cost = pl.CostEstimate(
        flops=2 * b_pad * (k_pad * h1 + h1 * h2 + h2 * n_out),
        transcendentals=b_pad * n_out,
        bytes_accessed=weight_bytes + b_pad * k_pad * 4 + b_pad * n_out * 4,
    )

    # Constant-index_map operands are fetched once and reused every grid step:
    # single-buffer them so they don't burn 2x VMEM.
    resident = dict(pipeline_mode=pl.Buffered(1))

    out = pl.pallas_call(
        _mlp_kernel,
        out_shape=jax.ShapeDtypeStruct((b_pad, n_out), jnp.float32),
        grid_spec=pltpu.PrefetchScalarGridSpec(
            num_scalar_prefetch=0,
            grid=grid,
            in_specs=[
                pl.BlockSpec((tm, k_pad), lambda i: (i, 0)),              # x tile
                pl.BlockSpec((k_pad, h1), lambda i: (0, 0), **resident),  # w1 (resident)
                pl.BlockSpec((1, h1), lambda i: (0, 0), **resident),      # shift1
                pl.BlockSpec((h1, h2), lambda i: (0, 0), **resident),     # w2 (resident)
                pl.BlockSpec((1, h2), lambda i: (0, 0), **resident),      # shift2
                pl.BlockSpec((h2, n_out), lambda i: (0, 0), **resident),  # w3 (resident)
                pl.BlockSpec((1, n_out), lambda i: (0, 0), **resident),   # b3
                pl.BlockSpec(memory_space=pltpu.MemorySpace.SMEM),        # PReLU slopes (2,)
            ],
            out_specs=pl.BlockSpec((tm, n_out), lambda i: (i, 0)),
        ),
        compiler_params=pltpu.CompilerParams(
            dimension_semantics=("parallel",),     # batch axis: megacore-shardable
            vmem_limit_bytes=vmem_limit,
        ),
        cost_estimate=cost,
    )(x, w1, s1, w2, s2, w3, b3, alpha)

    return out[:B, :num_classes]


def init_params(key, inputsize, num_classes):
    """Deterministic synthetic parameters matching the module's shapes."""
    ks = jax.random.split(key, 16)
    f32 = jnp.float32

    def lin(kw, kb, din, dout):
        bound = 1.0 / jnp.sqrt(din)
        w = jax.random.uniform(kw, (din, dout), f32, -bound, bound)
        b = jax.random.uniform(kb, (1, dout), f32, -bound, bound)
        return w, b

    w1, b1 = lin(ks[0], ks[1], inputsize, 1024)
    w2, b2 = lin(ks[2], ks[3], 1024, 512)
    w3, b3 = lin(ks[4], ks[5], 512, num_classes)

    def bn(kg, kb, km, kv, n):
        g = jax.random.uniform(kg, (1, n), f32, 0.5, 1.5)
        be = 0.1 * jax.random.normal(kb, (1, n), f32)
        m = 0.1 * jax.random.normal(km, (1, n), f32)
        v = jax.random.uniform(kv, (1, n), f32, 0.5, 1.5)
        return g, be, m, v

    g1, be1, m1, v1 = bn(ks[6], ks[7], ks[8], ks[9], 1024)
    g2, be2, m2, v2 = bn(ks[10], ks[11], ks[12], ks[13], 512)

    # nn.PReLU() default: single parameter initialized to 0.25
    a1 = jnp.full((1, 1), 0.25, f32)
    a2 = jnp.full((1, 1), 0.25, f32)

    return dict(w1=w1, b1=b1, g1=g1, be1=be1, m1=m1, v1=v1, a1=a1,
                w2=w2, b2=b2, g2=g2, be2=be2, m2=m2, v2=v2, a2=a2,
                w3=w3, b3=b3)


def reference_forward(x, p):
    """Pure-JAX f32 reference (eval-mode BatchNorm1d, identity dropout)."""
    def bn(h, g, be, m, v):
        return (h - m) * jax.lax.rsqrt(v + BN_EPS) * g + be

    def prelu(h, a):
        return jnp.where(h > 0, h, a[0, 0] * h)

    h = x @ p["w1"] + p["b1"]
    h = prelu(bn(h, p["g1"], p["be1"], p["m1"], p["v1"]), p["a1"])
    h = h @ p["w2"] + p["b2"]
    h = prelu(bn(h, p["g2"], p["be2"], p["m2"], p["v2"]), p["a2"])
    return jax.nn.sigmoid(h @ p["w3"] + p["b3"])


if __name__ == "__main__":
    # Small shapes consistent with the module: inputsize / num_classes are free;
    # hidden sizes 1024/512 are fixed by the module definition.
    batch, inputsize, num_classes = 8, 32, 4

    key = jax.random.PRNGKey(0)
    kx, kp = jax.random.split(key)
    x = jax.random.normal(kx, (batch, inputsize), jnp.float32)
    params = init_params(kp, inputsize, num_classes)
    prep = prepare_params(params)

    out = baseline_model1_forward(x, prep)
    out = jax.block_until_ready(out)

    ref = reference_forward(x, params)
    assert out.shape == (batch, num_classes)
    max_err = float(jnp.max(jnp.abs(out - ref)))
    # bf16 weights/activations (f32 accumulation) vs pure-f32 reference:
    # sigmoid outputs agree to well under 2e-2 absolute.
    assert max_err < 2e-2, f"mismatch vs JAX reference: max abs err {max_err}"

    print("KERNEL_OK")
</pallas_src>

<mosaic_0001>
module attributes {stable_mosaic.version = 11 : i64} {
  func.func @_mlp_kernel(%arg0: i32, %arg1: memref<16x128xf32, #tpu.memory_space<vmem>>, %arg2: memref<128x1024xbf16, #tpu.memory_space<vmem>>, %arg3: memref<1x1024xf32, #tpu.memory_space<vmem>>, %arg4: memref<1024x512xbf16, #tpu.memory_space<vmem>>, %arg5: memref<1x512xf32, #tpu.memory_space<vmem>>, %arg6: memref<512x128xbf16, #tpu.memory_space<vmem>>, %arg7: memref<1x128xf32, #tpu.memory_space<vmem>>, %arg8: memref<2xf32, #tpu.memory_space<smem>>, %arg9: memref<16x128xf32, #tpu.memory_space<vmem>>) attributes {dimension_semantics = [#tpu.dimension_semantics<parallel>], iteration_bounds = array<i64: 1>, scalar_prefetch = 0 : i64, scratch_operands = 0 : i64, tpu.core_type = #tpu.core_type<tc>, window_params = [{transform_indices = @transform_0, window_bounds = array<i64: 16, 128>}, {pipeline_mode = #tpu.pipeline_mode<synchronous>, transform_indices = @transform_1, window_bounds = array<i64: 128, 1024>}, {pipeline_mode = #tpu.pipeline_mode<synchronous>, transform_indices = @transform_2, window_bounds = array<i64: 1, 1024>}, {pipeline_mode = #tpu.pipeline_mode<synchronous>, transform_indices = @transform_3, window_bounds = array<i64: 1024, 512>}, {pipeline_mode = #tpu.pipeline_mode<synchronous>, transform_indices = @transform_4, window_bounds = array<i64: 1, 512>}, {pipeline_mode = #tpu.pipeline_mode<synchronous>, transform_indices = @transform_5, window_bounds = array<i64: 512, 128>}, {pipeline_mode = #tpu.pipeline_mode<synchronous>, transform_indices = @transform_6, window_bounds = array<i64: 1, 128>}, {transform_indices = @transform_7, window_bounds = array<i64: 2>}, {transform_indices = @transform_8, window_bounds = array<i64: 16, 128>}]} {
    %c0 = arith.constant 0 : index
    %c0_0 = arith.constant 0 : index
    %0 = vector.load %arg1[%c0, %c0_0] : memref<16x128xf32, #tpu.memory_space<vmem>>, vector<16x128xf32>
    %1 = arith.truncf %0 : vector<16x128xf32> to vector<16x128xbf16>
    %c0_1 = arith.constant 0 : index
    %c0_2 = arith.constant 0 : index
    %2 = vector.load %arg2[%c0_1, %c0_2] : memref<128x1024xbf16, #tpu.memory_space<vmem>>, vector<128x1024xbf16>
    %cst = arith.constant dense<0.000000e+00> : vector<16x1024xf32>
    %3 = tpu.matmul %1, %2, %cst {dimension_numbers = #tpu.dot_dimension_numbers<[1], [0], [0], [1], [0, 0, 1, 1], [], []>} : vector<16x128xbf16>, vector<128x1024xbf16>, vector<16x1024xf32> -> vector<16x1024xf32>
    %c0_3 = arith.constant 0 : index
    %c0_4 = arith.constant 0 : index
    %4 = vector.load %arg3[%c0_3, %c0_4] : memref<1x1024xf32, #tpu.memory_space<vmem>>, vector<1x1024xf32>
    %5 = vector.broadcast %4 : vector<1x1024xf32> to vector<16x1024xf32>
    %6 = arith.addf %3, %5 : vector<16x1024xf32>
    %cst_5 = arith.constant 0.000000e+00 : f32
    %7 = vector.broadcast %cst_5 : f32 to vector<16x1024xf32>
    %8 = arith.cmpf ogt, %6, %7 : vector<16x1024xf32>
    %c0_6 = arith.constant 0 : index
    %9 = memref.load %arg8[%c0_6] : memref<2xf32, #tpu.memory_space<smem>>
    %10 = vector.broadcast %9 : f32 to vector<16x1024xf32>
    %11 = arith.mulf %10, %6 : vector<16x1024xf32>
    %12 = arith.select %8, %6, %11 : vector<16x1024xi1>, vector<16x1024xf32>
    %13 = arith.truncf %12 : vector<16x1024xf32> to vector<16x1024xbf16>
    %c0_7 = arith.constant 0 : index
    %c0_8 = arith.constant 0 : index
    %14 = vector.load %arg4[%c0_7, %c0_8] : memref<1024x512xbf16, #tpu.memory_space<vmem>>, vector<1024x512xbf16>
    %cst_9 = arith.constant dense<0.000000e+00> : vector<16x512xf32>
    %15 = tpu.matmul %13, %14, %cst_9 {dimension_numbers = #tpu.dot_dimension_numbers<[1], [0], [0], [1], [0, 0, 1, 1], [], []>} : vector<16x1024xbf16>, vector<1024x512xbf16>, vector<16x512xf32> -> vector<16x512xf32>
    %c0_10 = arith.constant 0 : index
    %c0_11 = arith.constant 0 : index
    %16 = vector.load %arg5[%c0_10, %c0_11] : memref<1x512xf32, #tpu.memory_space<vmem>>, vector<1x512xf32>
    %17 = vector.broadcast %16 : vector<1x512xf32> to vector<16x512xf32>
    %18 = arith.addf %15, %17 : vector<16x512xf32>
    %cst_12 = arith.constant 0.000000e+00 : f32
    %19 = vector.broadcast %cst_12 : f32 to vector<16x512xf32>
    %20 = arith.cmpf ogt, %18, %19 : vector<16x512xf32>
    %c1 = arith.constant 1 : index
    %21 = memref.load %arg8[%c1] : memref<2xf32, #tpu.memory_space<smem>>
    %22 = vector.broadcast %21 : f32 to vector<16x512xf32>
    %23 = arith.mulf %22, %18 : vector<16x512xf32>
    %24 = arith.select %20, %18, %23 : vector<16x512xi1>, vector<16x512xf32>
    %25 = arith.truncf %24 : vector<16x512xf32> to vector<16x512xbf16>
    %c0_13 = arith.constant 0 : index
    %c0_14 = arith.constant 0 : index
    %26 = vector.load %arg6[%c0_13, %c0_14] : memref<512x128xbf16, #tpu.memory_space<vmem>>, vector<512x128xbf16>
    %cst_15 = arith.constant dense<0.000000e+00> : vector<16x128xf32>
    %27 = tpu.matmul %25, %26, %cst_15 {dimension_numbers = #tpu.dot_dimension_numbers<[1], [0], [0], [1], [0, 0, 1, 1], [], []>} : vector<16x512xbf16>, vector<512x128xbf16>, vector<16x128xf32> -> vector<16x128xf32>
    %c0_16 = arith.constant 0 : index
    %c0_17 = arith.constant 0 : index
    %28 = vector.load %arg7[%c0_16, %c0_17] : memref<1x128xf32, #tpu.memory_space<vmem>>, vector<1x128xf32>
    %29 = vector.broadcast %28 : vector<1x128xf32> to vector<16x128xf32>
    %30 = arith.addf %27, %29 : vector<16x128xf32>
    %31 = arith.negf %30 : vector<16x128xf32>
    %32 = math.exp %31 : vector<16x128xf32>
    %cst_18 = arith.constant 1.000000e+00 : f32
    %33 = vector.broadcast %cst_18 : f32 to vector<16x128xf32>
    %34 = arith.addf %33, %32 : vector<16x128xf32>
    %35 = arith.divf %33, %34 : vector<16x128xf32>
    %c0_19 = arith.constant 0 : index
    %c0_20 = arith.constant 0 : index
    %36 = vector.load %arg9[%c0_19, %c0_20] : memref<16x128xf32, #tpu.memory_space<vmem>>, vector<16x128xf32>
    tpu.vector_store %arg9[%c0_19, %c0_20], %35 {strides = array<i32>} : memref<16x128xf32, #tpu.memory_space<vmem>>, vector<16x128xf32>,
    return
  }
  func.func @transform_0(%arg0: i32) -> (i32, i32) {
    %c0_i32 = arith.constant 0 : i32
    %c0_i32_0 = arith.constant 0 : i32
    return %arg0, %c0_i32 : i32, i32
  }
  func.func @transform_1(%arg0: i32) -> (i32, i32) {
    %c0_i32 = arith.constant 0 : i32
    %c0_i32_0 = arith.constant 0 : i32
    %c0_i32_1 = arith.constant 0 : i32
    return %c0_i32, %c0_i32_0 : i32, i32
  }
  func.func @transform_2(%arg0: i32) -> (i32, i32) {
    %c0_i32 = arith.constant 0 : i32
    %c0_i32_0 = arith.constant 0 : i32
    %c0_i32_1 = arith.constant 0 : i32
    return %c0_i32, %c0_i32_0 : i32, i32
  }
  func.func @transform_3(%arg0: i32) -> (i32, i32) {
    %c0_i32 = arith.constant 0 : i32
    %c0_i32_0 = arith.constant 0 : i32
    %c0_i32_1 = arith.constant 0 : i32
    return %c0_i32, %c0_i32_0 : i32, i32
  }
  func.func @transform_4(%arg0: i32) -> (i32, i32) {
    %c0_i32 = arith.constant 0 : i32
    %c0_i32_0 = arith.constant 0 : i32
    %c0_i32_1 = arith.constant 0 : i32
    return %c0_i32, %c0_i32_0 : i32, i32
  }
  func.func @transform_5(%arg0: i32) -> (i32, i32) {
    %c0_i32 = arith.constant 0 : i32
    %c0_i32_0 = arith.constant 0 : i32
    %c0_i32_1 = arith.constant 0 : i32
    return %c0_i32, %c0_i32_0 : i32, i32
  }
  func.func @transform_6(%arg0: i32) -> (i32, i32) {
    %c0_i32 = arith.constant 0 : i32
    %c0_i32_0 = arith.constant 0 : i32
    %c0_i32_1 = arith.constant 0 : i32
    return %c0_i32, %c0_i32_0 : i32, i32
  }
  func.func @transform_7(%arg0: i32) -> i32 {
    %c0_i32 = arith.constant 0 : i32
    %c0_i32_0 = arith.constant 0 : i32
    return %c0_i32 : i32
  }
  func.func @transform_8(%arg0: i32) -> (i32, i32) {
    %c0_i32 = arith.constant 0 : i32
    %c0_i32_0 = arith.constant 0 : i32
    return %arg0, %c0_i32 : i32, i32
  }
}

</mosaic_0001>

<bundles_post_ra>
// kernel: tpu_custom_call.1
= control target key start
LH: loop header
LB: loop body
LE: loop exit
PB: predicated region body
PF: predicated region fallthrough
CT: control target
= control target key end

     0   :  { %13 = vsyncpa [#allocation3], 0  ;;  %s4341_s0 = inlined_call_operand.hbm [shape: f32[16,128], index: 0, kind: input, shape index: {}]   ;;  %s4342_s1 = inlined_call_operand.hbm [shape: bf16[128,1024], index: 1, kind: input, shape index: {}]   ;;  %s4343_s2 = inlined_call_operand.hbm [shape: f32[1,1024], index: 2, kind: input, shape index: {}]   ;;  %s4344_s3 = inlined_call_operand.hbm [shape: bf16[1024,512], index: 3, kind: input, shape index: {}]   ;;  %s4345_s4 = inlined_call_operand.vmem [shape: f32[1,512], index: 4, kind: input, shape index: {}]   ;;  %s4346_s5 = inlined_call_operand.hbm [shape: bf16[512,128], index: 5, kind: input, shape index: {}]   ;;  %s4347_s6 = inlined_call_operand.vmem [shape: f32[1,128], index: 6, kind: input, shape index: {}]   ;;  %s4348_s7 = inlined_call_operand.vmem [shape: f32[2], index: 7, kind: input, shape index: {}]   ;;  %s4349_s8 = inlined_call_operand.hbm [shape: f32[16,128], index: 8, kind: output, shape index: {}]  }
   0x1   :  { %14 = vsyncpa [#allocation7], 0 }
   0x2   :  { %15 = vsyncpa [#allocation10], 0 }
   0x3   :  { %16 = vsyncpa [#allocation5], 0 }
   0x4   :  { %17 = vsyncpa [#allocation4], 0  ;;  %s4106_s27 = smov [#allocation6]   ;;  %s3952_s9 = scalar_lea.hbm %s4342_s1, 8192 }
   0x5   :  { %s35_s28 = sshll.u32 %s4106_s27, 4  ;;  %p3953_p0 = scmp.ne.s32.totalorder %s4342_s1, %s3952_s9  ;;  %s36_s28 = int_to_ptr.vmem [resolvable:$true] %s35_s28 }
   0x6   :  { %p3956_p1 = scmp.lt.u32.totalorder %s3952_s9, %s4342_s1 }
   0x8   :  { %p3958_p2 = pnand %p3956_p1, %p3953_p0 }
   0xa   :  { %3961 = shalt.err (!%p3958_p2)
}
   0xb   :  { %s3962_s14 = scalar_lea.vmem %s36_s28, 8192  ;;  %p3967_p4 = scmp.lt.s32.totalorder %s36_s28, %s36_s28 }
   0xc   :  { %p3963_p3 = scmp.ne.s32.totalorder %s36_s28, %s3962_s14  ;;  %p3968_p5 = scmp.lt.s32.totalorder %s3962_s14, %s3962_s14 }
   0xe   :  { %p3969_p6 = por %p3968_p5, %p3967_p4 }
  0x10   :  { %p3970_p7 = pnand %p3969_p6, %p3963_p3 }
  0x12   :  { %3973 = shalt.err (!%p3970_p7)
}
  0x13   :  { %s4107_s15 = smov 512   ;;  %s4108_s16 = smov 32  }
  0x14   :  { %41 = dma.hbm_to_vmem [thread:$0]  %s4342_s1, 8192, %s36_s28, [#allocation7], %s4107_s15, %s4107_s15, %s4108_s16  }
  0x15   :  { %s4109_s19 = smov [#allocation9]   ;;  %s3974_s23 = scalar_lea.hbm %s4344_s3, 32768 }
  0x16   :  { %s57_s20 = sshll.u32 %s4109_s19, 4  ;;  %p3975_p8 = scmp.ne.s32.totalorder %s4344_s3, %s3974_s23  ;;  %s58_s20 = int_to_ptr.vmem [resolvable:$true] %s57_s20 }
  0x17   :  { %p3978_p9 = scmp.lt.u32.totalorder %s3974_s23, %s4344_s3 }
  0x19   :  { %p3980_p10 = pnand %p3978_p9, %p3975_p8 }
  0x1b   :  { %3983 = shalt.err (!%p3980_p10)
}
  0x1c   :  { %s3984_s29 = scalar_lea.vmem %s58_s20, 32768  ;;  %p3989_p12 = scmp.lt.s32.totalorder %s58_s20, %s58_s20 }
  0x1d   :  { %p3985_p11 = scmp.ne.s32.totalorder %s58_s20, %s3984_s29  ;;  %p3990_p13 = scmp.lt.s32.totalorder %s3984_s29, %s3984_s29 }
  0x1f   :  { %p3991_p0 = por %p3990_p13, %p3989_p12 }
  0x21   :  { %p3992_p1 = pnand %p3991_p0, %p3985_p11 }
  0x23   :  { %3995 = shalt.err (!%p3992_p1)
}
  0x24   :  { %s4110_s1 = smov 256   ;;  %s4111_s28 = smov 16  }
  0x25   :  { %63 = dma.hbm_to_vmem [thread:$0]  %s4344_s3, 32768, %s58_s20, [#allocation10], %s4110_s1, %s4110_s1, %s4111_s28  }
  0x26   :  { %s4112_s10 = smov [#allocation2]   ;;  %s3996_s14 = scalar_lea.hbm %s4341_s0, 256 }
  0x27   :  { %s23_s11 = sshll.u32 %s4112_s10, 4  ;;  %p3997_p2 = scmp.ne.s32.totalorder %s4341_s0, %s3996_s14  ;;  %s24_s11 = int_to_ptr.vmem [resolvable:$true] %s23_s11 }
  0x28   :  { %p4000_p3 = scmp.lt.u32.totalorder %s3996_s14, %s4341_s0 }
  0x2a   :  { %p4002_p4 = pnand %p4000_p3, %p3997_p2 }
  0x2c   :  { %4005 = shalt.err (!%p4002_p4)
}
  0x2d   :  { %s4006_s19 = scalar_lea.vmem %s24_s11, 256  ;;  %p4011_p6 = scmp.lt.s32.totalorder %s24_s11, %s24_s11 }
  0x2e   :  { %p4007_p5 = scmp.ne.s32.totalorder %s24_s11, %s4006_s19  ;;  %p4012_p7 = scmp.lt.s32.totalorder %s4006_s19, %s4006_s19 }
  0x30   :  { %p4013_p8 = por %p4012_p7, %p4011_p6 }
  0x32   :  { %p4014_p9 = pnand %p4013_p8, %p4007_p5 }
  0x34   :  { %4017 = shalt.err (!%p4014_p9)
}
  0x35   :  { %s4113_s3 = smov 128   ;;  %s4114_s20 = smov 8  }
  0x36   :  { %29 = dma.hbm_to_vmem [thread:$0]  %s4341_s0, 256, %s24_s11, [#allocation3], %s4113_s3, %s4113_s3, %s4114_s20  }
  0x37   :  { %s4115_s23 = smov [#allocation8]   ;;  %s4116_s25 = smov [#allocation11]  }
  0x38   :  { %s48_s24 = sshll.u32 %s4115_s23, 4  ;;  %s71_s26 = sshll.u32 %s4116_s25, 4  ;;  %s49_s24 = int_to_ptr.vmem [resolvable:$true] %s48_s24  ;;  %s72_s26 = int_to_ptr.vmem [resolvable:$true] %s71_s26 }
  0x39   :  { %s4018_s1 = scalar_lea.hbm %s4343_s2, 128 }
  0x3a   :  { %p4019_p10 = scmp.ne.s32.totalorder %s4343_s2, %s4018_s1  ;;  %p4022_p11 = scmp.lt.u32.totalorder %s4018_s1, %s4343_s2 }
  0x3c   :  { %p4024_p12 = pnand %p4022_p11, %p4019_p10 }
  0x3e   :  { %4027 = shalt.err (!%p4024_p12)
}
  0x3f   :  { %s4028_s0 = scalar_lea.vmem %s49_s24, 128  ;;  %p4033_p0 = scmp.lt.s32.totalorder %s49_s24, %s49_s24 }
  0x40   :  { %p4029_p13 = scmp.ne.s32.totalorder %s49_s24, %s4028_s0  ;;  %p4034_p1 = scmp.lt.s32.totalorder %s4028_s0, %s4028_s0 }
  0x42   :  { %p4035_p2 = por %p4034_p1, %p4033_p0 }
  0x44   :  { %p4036_p3 = pnand %p4035_p2, %p4029_p13 }
  0x46   :  { %4039 = shalt.err (!%p4036_p3)
}
  0x47   :  { %51 = dma.hbm_to_vmem [thread:$0]  %s4343_s2, 128, %s49_s24, [#allocation7]  }
  0x48   :  { %s86_s15 = sshll.u32 %s4348_s7, 4  ;;  %s4040_s18 = scalar_lea.hbm %s4346_s5, 4096  ;;  %s87_s15 = int_to_ptr.vmem [resolvable:$true] %s86_s15 }
  0x49   :  { %p4041_p4 = scmp.ne.s32.totalorder %s4346_s5, %s4040_s18  ;;  %p4044_p5 = scmp.lt.u32.totalorder %s4040_s18, %s4346_s5 }
  0x4b   :  { %p4046_p6 = pnand %p4044_p5, %p4041_p4 }
  0x4d   :  { %4049 = shalt.err (!%p4046_p6)
}
  0x4e   :  { %s4050_s2 = scalar_lea.vmem %s72_s26, 4096  ;;  %p4055_p8 = scmp.lt.s32.totalorder %s72_s26, %s72_s26 }
  0x4f   :  { %p4051_p7 = scmp.ne.s32.totalorder %s72_s26, %s4050_s2  ;;  %p4056_p9 = scmp.lt.s32.totalorder %s4050_s2, %s4050_s2 }
  0x51   :  { %p4057_p10 = por %p4056_p9, %p4055_p8 }
  0x53   :  { %p4058_p11 = pnand %p4057_p10, %p4051_p7 }
  0x55   :  { %4061 = shalt.err (!%p4058_p11)
}
  0x56   :  { %s4117_s7 = smov 64   ;;  %s4118_s24 = smov 4  }
  0x57   :  { %77 = dma.hbm_to_vmem [thread:$0]  %s4346_s5, 4096, %s72_s26, [#allocation10], %s4117_s7, %s4117_s7, %s4118_s24  }
  0x58   :  { %s4062_s29 = scalar_lea.vmem %s87_s15, 16  ;;  %p4067_p13 = scmp.lt.s32.totalorder %s87_s15, %s87_s15 }
  0x59   :  { %p4063_p12 = scmp.ne.s32.totalorder %s87_s15, %s4062_s29  ;;  %p4068_p0 = scmp.lt.s32.totalorder %s4062_s29, %s4062_s29 }
  0x5b   :  { %p4069_p1 = por %p4068_p0, %p4067_p13 }
  0x5d   :  { %p4070_p2 = pnand %p4069_p1, %p4063_p12 }
  0x5f   :  { %4073 = shalt.err (!%p4070_p2)
}
  0x60   :  { %s4119_s1 = smov [#allocation12]  }
  0x61   :  { %89 = dma.vmem_to_smem %s87_s15, 16, %s4119_s1, [#allocation5]  }
  0x62   :  { %4096 = dma.done.wait [#allocation3], 256  }
  0x63   :  { %4097 = vsyncadd [#allocation3], 4294967040 }
  0x64   :  { %4098 = dma.done.wait [#allocation7], 8320  }
  0x65   :  { %4099 = vsyncadd [#allocation7], 4294958976 }
  0x66   :  { %4100 = dma.done.wait [#allocation10], 36864  }
  0x67   :  { %4101 = vsyncadd [#allocation10], 4294930432 }
  0x68   :  { %4102 = dma.done.wait [#allocation5], 16  }
  0x69   :  { %4103 = vsyncadd [#allocation5], 4294967280 }
  0x6a   :  { %108 = sfence }
  0x6b   :  { %v113_v0 = vld [vmem:[#allocation6] sm:$0xff]  ;;  %v4120_v6 = vmov 0   ;;  %v114_v14 = vld [vmem:[#allocation6 + $0x8] sm:$0xff]  ;;  %v115_v57 = vld [vmem:[#allocation6 + $0x10] sm:$0xff]  ;;  %s727_s5 = sld [smem:[#allocation12]]  ;;  %s3400_s26 = sld [smem:[#allocation12 + $0x1]] }
  0x6c   :  { %v117_v1 = vld [vmem:[#allocation6 + $0x20] sm:$0xff]  ;;  %571 = vmatprep.mubr.bf16.mxu0 %v4120_v6  ;;  %614 = vmatprep.mubr.bf16.mxu1 %v4120_v6  ;;  %v118_v15 = vld [vmem:[#allocation6 + $0x28] sm:$0xff]  ;;  %v110_v58 = vld [vmem:[#allocation2] sm:$0xff] }
  0x6d   :  { %v121_v2 = vld [vmem:[#allocation6 + $0x40] sm:$0xff]  ;;  %v3081_v3 = vcombine.high %v113_v0, %v117_v1  ;;  %v3080_v4 = vcombine.low %v113_v0, %v117_v1  ;;  %v122_v16 = vld [vmem:[#allocation6 + $0x48] sm:$0xff]  ;;  %v3083_v17 = vcombine.high %v114_v14, %v118_v15  ;;  %v3082_v18 = vcombine.low %v114_v14, %v118_v15  ;;  %v119_v60 = vld [vmem:[#allocation6 + $0x30] sm:$0xff] }
  0x6e   :  { %v125_v5 = vld [vmem:[#allocation6 + $0x60] sm:$0xff]  ;;  %v126_v19 = vld [vmem:[#allocation6 + $0x68] sm:$0xff]  ;;  %v111_v61 = vld [vmem:[#allocation2 + $0x8] sm:$0xff] }
  0x6f   :  { %v3089_v7 = vcombine.high %v121_v2, %v125_v5  ;;  %v129_v8 = vld [vmem:[#allocation6 + $0x80] sm:$0xff]  ;;  %539 = vmatprep.subr.bf16.mxu0 %v3081_v3  ;;  %v3088_v10 = vcombine.low %v121_v2, %v125_v5  ;;  %v3091_v21 = vcombine.high %v122_v16, %v126_v19  ;;  %v130_v22 = vld [vmem:[#allocation6 + $0x88] sm:$0xff]  ;;  %582 = vmatprep.subr.bf16.mxu1 %v3083_v17  ;;  %v123_v3 = vld [vmem:[#allocation6 + $0x50] sm:$0xff] }
  0x70   :  { %v133_v9 = vld [vmem:[#allocation6 + $0xa0] sm:$0xff]  ;;  %540 = vmatpush1.bf16.msra.mxu0 %v3080_v4  ;;  %v134_v23 = vld [vmem:[#allocation6 + $0xa8] sm:$0xff]  ;;  %583 = vmatpush1.bf16.msra.mxu1 %v3082_v18  ;;  %v3090_v27 = vcombine.low %v122_v16, %v126_v19  ;;  %v3085_v2 = vcombine.high %v115_v57, %v119_v60  ;;  %v127_v5 = vld [vmem:[#allocation6 + $0x70] sm:$0xff] }
  0x71   :  { %541 = vmatprep.subr.bf16.mxu0 %v3089_v7  ;;  %v3097_v11 = vcombine.high %v129_v8, %v133_v9  ;;  %v137_v12 = vld [vmem:[#allocation6 + $0xc0] sm:$0xff]  ;;  %v3096_v20 = vcombine.low %v129_v8, %v133_v9  ;;  %584 = vmatprep.subr.bf16.mxu1 %v3091_v21  ;;  %v3099_v28 = vcombine.high %v130_v22, %v134_v23  ;;  %v138_v30 = vld [vmem:[#allocation6 + $0xc8] sm:$0xff]  ;;  %v135_v15 = vld [vmem:[#allocation6 + $0xb0] sm:$0xff] }
  0x72   :  { %v141_v13 = vld [vmem:[#allocation6 + $0xe0] sm:$0xff]  ;;  %v142_v31 = vld [vmem:[#allocation6 + $0xe8] sm:$0xff]  ;;  %v3098_v35 = vcombine.low %v130_v22, %v134_v23  ;;  %v4235_v7 = vpack.c.bf16 %v111_v61, %v110_v58  ;;  %v3084_v9 = vcombine.low %v115_v57, %v119_v60  ;;  %v3092_v17 = vcombine.low %v123_v3, %v127_v5  ;;  %v124_v18 = vld [vmem:[#allocation6 + $0x58] sm:$0xff] }
  0x73   :  { %v3105_v24 = vcombine.high %v137_v12, %v141_v13  ;;  %v145_v25 = vld [vmem:[#allocation6 + $0x100] sm:$0xff]  ;;  %v3104_v29 = vcombine.low %v137_v12, %v141_v13  ;;  %v3107_v36 = vcombine.high %v138_v30, %v142_v31  ;;  %v146_v38 = vld [vmem:[#allocation6 + $0x108] sm:$0xff]  ;;  %v3106_v43 = vcombine.low %v138_v30, %v142_v31  ;;  %v131_v13 = vld [vmem:[#allocation6 + $0x90] sm:$0xff] }
  0x74   :  { %542 = vmatpush1.bf16.msra.mxu0 %v3088_v10  ;;  %v149_v26 = vld [vmem:[#allocation6 + $0x120] sm:$0xff]  ;;  %585 = vmatpush1.bf16.msra.mxu1 %v3090_v27  ;;  %v150_v39 = vld [vmem:[#allocation6 + $0x128] sm:$0xff]  ;;  %v116_v10 = vld [vmem:[#allocation6 + $0x18] sm:$0xff]  ;;  %v3093_v12 = vcombine.high %v123_v3, %v127_v5 }
  0x75   :  { %543 = vmatprep.subr.bf16.mxu0 %v3097_v11  ;;  %v3113_v32 = vcombine.high %v145_v25, %v149_v26  ;;  %v153_v33 = vld [vmem:[#allocation6 + $0x140] sm:$0xff]  ;;  %586 = vmatprep.subr.bf16.mxu1 %v3099_v28  ;;  %v3112_v37 = vcombine.low %v145_v25, %v149_v26  ;;  %v3115_v44 = vcombine.high %v146_v38, %v150_v39  ;;  %v154_v46 = vld [vmem:[#allocation6 + $0x148] sm:$0xff]  ;;  %v120_v11 = vld [vmem:[#allocation6 + $0x38] sm:$0xff] }
  0x76   :  { %v157_v34 = vld [vmem:[#allocation6 + $0x160] sm:$0xff]  ;;  %v158_v47 = vld [vmem:[#allocation6 + $0x168] sm:$0xff]  ;;  %v3114_v51 = vcombine.low %v146_v38, %v150_v39  ;;  %v3087_v16 = vcombine.high %v116_v10, %v120_v11  ;;  %v128_v19 = vld [vmem:[#allocation6 + $0x78] sm:$0xff]  ;;  %v3086_v23 = vcombine.low %v116_v10, %v120_v11  ;;  %v3100_v25 = vcombine.low %v131_v13, %v135_v15 }
  0x77   :  { %v3121_v40 = vcombine.high %v153_v33, %v157_v34  ;;  %v161_v41 = vld [vmem:[#allocation6 + $0x180] sm:$0xff]  ;;  %v3120_v45 = vcombine.low %v153_v33, %v157_v34  ;;  %v3123_v52 = vcombine.high %v154_v46, %v158_v47  ;;  %v162_v54 = vld [vmem:[#allocation6 + $0x188] sm:$0xff]  ;;  %v3122_v59 = vcombine.low %v154_v46, %v158_v47  ;;  %v139_v21 = vld [vmem:[#allocation6 + $0xd0] sm:$0xff] }
  0x78   :  { %544 = vmatpush1.bf16.msra.mxu0 %v3096_v20  ;;  %v165_v42 = vld [vmem:[#allocation6 + $0x1a0] sm:$0xff]  ;;  %587 = vmatpush1.bf16.msra.mxu1 %v3098_v35  ;;  %v166_v55 = vld [vmem:[#allocation6 + $0x1a8] sm:$0xff]  ;;  %v3101_v20 = vcombine.high %v131_v13, %v135_v15  ;;  %v143_v22 = vld [vmem:[#allocation6 + $0xf0] sm:$0xff]  ;;  %v3094_v31 = vcombine.low %v124_v18, %v128_v19 }
  0x79   :  { %545 = vmatprep.subr.bf16.mxu0 %v3105_v24  ;;  %588 = vmatprep.subr.bf16.mxu1 %v3107_v36  ;;  %v3129_v48 = vcombine.high %v161_v41, %v165_v42  ;;  %v169_v49 = vld [vmem:[#allocation6 + $0x1c0] sm:$0xff]  ;;  %v3128_v53 = vcombine.low %v161_v41, %v165_v42  ;;  %v3131_v62 = vcombine.high %v162_v54, %v166_v55  ;;  %v170_v0 = vld [vmem:[#allocation6 + $0x1c8] sm:$0xff]  ;;  %v132_v26 = vld [vmem:[#allocation6 + $0x98] sm:$0xff] }
  0x7a   :  { %v173_v50 = vld [vmem:[#allocation6 + $0x1e0] sm:$0xff]  ;;  %v174_v1 = vld [vmem:[#allocation6 + $0x1e8] sm:$0xff]  ;;  %v3130_v4 = vcombine.low %v162_v54, %v166_v55  ;;  %v3095_v24 = vcombine.high %v124_v18, %v128_v19  ;;  %v136_v27 = vld [vmem:[#allocation6 + $0xb8] sm:$0xff]  ;;  %v3109_v28 = vcombine.high %v139_v21, %v143_v22  ;;  %v3108_v33 = vcombine.low %v139_v21, %v143_v22 }
  0x7b   :  { %v3137_v56 = vcombine.high %v169_v49, %v173_v50  ;;  %v3136_v63 = vcombine.low %v169_v49, %v173_v50  ;;  %v3139_v8 = vcombine.high %v170_v0, %v174_v1  ;;  %v3138_v14 = vcombine.low %v170_v0, %v174_v1  ;;  %v151_v30 = vld [vmem:[#allocation6 + $0x130] sm:$0xff]  ;;  %v140_v34 = vld [vmem:[#allocation6 + $0xd8] sm:$0xff] }
  0x7c   :  { %546 = vmatpush1.bf16.msra.mxu0 %v3104_v29  ;;  %589 = vmatpush1.bf16.msra.mxu1 %v3106_v43  ;;  %v147_v29 = vld [vmem:[#allocation6 + $0x110] sm:$0xff]  ;;  %v144_v35 = vld [vmem:[#allocation6 + $0xf8] sm:$0xff]  ;;  %v3102_v39 = vcombine.low %v132_v26, %v136_v27 }
  0x7d   :  { %547 = vmatprep.subr.bf16.mxu0 %v3113_v32  ;;  %590 = vmatprep.subr.bf16.mxu1 %v3115_v44  ;;  %v3103_v32 = vcombine.high %v132_v26, %v136_v27  ;;  %v3117_v36 = vcombine.high %v147_v29, %v151_v30  ;;  %v159_v38 = vld [vmem:[#allocation6 + $0x170] sm:$0xff]  ;;  %v3116_v41 = vcombine.low %v147_v29, %v151_v30  ;;  %v148_v42 = vld [vmem:[#allocation6 + $0x118] sm:$0xff] }
  0x7e   :  { %v152_v43 = vld [vmem:[#allocation6 + $0x138] sm:$0xff]  ;;  %v163_v44 = vld [vmem:[#allocation6 + $0x190] sm:$0xff]  ;;  %v3110_v46 = vcombine.low %v140_v34, %v144_v35 }
  0x7f   :  { %v3119_v47 = vcombine.high %v148_v42, %v152_v43  ;;  %v156_v49 = vld [vmem:[#allocation6 + $0x158] sm:$0xff]  ;;  %v3118_v54 = vcombine.low %v148_v42, %v152_v43  ;;  %v3539_v13 = vld [vmem:[#allocation9 + $0x2c] ss:$16 sps:$4 sm:$0xff]   ;;  %v3555_v27 = vld [vmem:[#allocation9 + $0x88] ss:$16 sps:$4 sm:$0xff]  }
  0x80   :  { %548 = vmatpush1.bf16.msra.mxu0 %v3112_v37  ;;  %591 = vmatpush1.bf16.msra.mxu1 %v3114_v51  ;;  %v155_v37 = vld [vmem:[#allocation6 + $0x150] sm:$0xff]  ;;  %v160_v50 = vld [vmem:[#allocation6 + $0x178] sm:$0xff] }
  0x81   :  { %549 = vmatprep.subr.bf16.mxu0 %v3121_v40  ;;  %592 = vmatprep.subr.bf16.mxu1 %v3123_v52  ;;  %v3111_v40 = vcombine.high %v140_v34, %v144_v35  ;;  %v171_v52 = vld [vmem:[#allocation6 + $0x1d0] sm:$0xff]  ;;  %v3127_v55 = vcombine.high %v156_v49, %v160_v50  ;;  %v164_v57 = vld [vmem:[#allocation6 + $0x198] sm:$0xff]  ;;  %v3126_v60 = vcombine.low %v156_v49, %v160_v50 }
  0x82   :  { %v168_v58 = vld [vmem:[#allocation6 + $0x1b8] sm:$0xff]  ;;  %v3551_v21 = vld [vmem:[#allocation9 + $0x6c] ss:$16 sps:$4 sm:$0xff]   ;;  %v3567_v35 = vld [vmem:[#allocation9 + $0xc8] ss:$16 sps:$4 sm:$0xff]  }
  0x83   :  { %v172_v61 = vld [vmem:[#allocation6 + $0x1d8] sm:$0xff]  ;;  %v3579_v43 = vld [vmem:[#allocation9 + $0x108] ss:$16 sps:$4 sm:$0xff]  }
  0x84   :  { %550 = vmatpush1.bf16.msra.mxu0 %v3120_v45  ;;  %593 = vmatpush1.bf16.msra.mxu1 %v3122_v59  ;;  %v167_v45 = vld [vmem:[#allocation6 + $0x1b0] sm:$0xff]  ;;  %v3530_v0 = vld [vmem:[#allocation9 + $0x4] ss:$16 sps:$4 sm:$0xff]   ;;  %v3528_v3 = vld [vmem:[#allocation9] ss:$16 sps:$4 sm:$0xff]  }
  0x85   :  { %551 = vmatprep.subr.bf16.mxu0 %v3129_v48  ;;  %594 = vmatprep.subr.bf16.mxu1 %v3131_v62  ;;  %v3124_v48 = vcombine.low %v155_v37, %v159_v38  ;;  %v3133_v51 = vcombine.high %v163_v44, %v167_v45  ;;  %v3135_v62 = vcombine.high %v164_v57, %v168_v58  ;;  %v3536_v5 = vld [vmem:[#allocation9 + $0x24] ss:$16 sps:$4 sm:$0xff]   ;;  %v3534_v10 = vld [vmem:[#allocation9 + $0x20] ss:$16 sps:$4 sm:$0xff]   ;;  %v3591_v50 = vld [vmem:[#allocation9 + $0x148] ss:$16 sps:$4 sm:$0xff]  }
  0x86   :  { %v3542_v11 = vld [vmem:[#allocation9 + $0x44] ss:$16 sps:$4 sm:$0xff]   ;;  %v3546_v18 = vld [vmem:[#allocation9 + $0x60] ss:$16 sps:$4 sm:$0xff]  }
  0x87   :  { %v3548_v15 = vld [vmem:[#allocation9 + $0x64] ss:$16 sps:$4 sm:$0xff]   ;;  %v3552_v22 = vld [vmem:[#allocation9 + $0x80] ss:$16 sps:$4 sm:$0xff]  }
  0x88   :  { %552 = vmatpush1.bf16.msra.mxu0 %v3128_v53  ;;  %595 = vmatpush1.bf16.msra.mxu1 %v3130_v4  ;;  %v175_v53 = vld [vmem:[#allocation6 + $0x1f0] sm:$0xff]  ;;  %v3554_v19 = vld [vmem:[#allocation9 + $0x84] ss:$16 sps:$4 sm:$0xff]   ;;  %v3564_v29 = vld [vmem:[#allocation9 + $0xc0] ss:$16 sps:$4 sm:$0xff]  }
  0x89   :  { %553 = vmatprep.subr.bf16.mxu0 %v3137_v56  ;;  %596 = vmatprep.subr.bf16.mxu1 %v3139_v8  ;;  %v3132_v56 = vcombine.low %v163_v44, %v167_v45  ;;  %v3141_v59 = vcombine.high %v171_v52, %v175_v53  ;;  %v3140_v1 = vcombine.low %v171_v52, %v175_v53  ;;  %v3533_v8 = vld [vmem:[#allocation9 + $0xc] ss:$16 sps:$4 sm:$0xff]   ;;  %v3566_v26 = vld [vmem:[#allocation9 + $0xc4] ss:$16 sps:$4 sm:$0xff]   ;;  %v3588_v44 = vld [vmem:[#allocation9 + $0x140] ss:$16 sps:$4 sm:$0xff]  }
  0x8a   :  { %v3572_v30 = vld [vmem:[#allocation9 + $0xe4] ss:$16 sps:$4 sm:$0xff]   ;;  %v3600_v52 = vld [vmem:[#allocation9 + $0x180] ss:$16 sps:$4 sm:$0xff]  }
  0x8b   :  { %v3578_v34 = vld [vmem:[#allocation9 + $0x104] ss:$16 sps:$4 sm:$0xff]  }
  0x8c   :  { %554 = vmatpush1.bf16.msra.mxu0 %v3136_v63  ;;  %597 = vmatpush1.bf16.msra.mxu1 %v3138_v14  ;;  %v176_v63 = vld [vmem:[#allocation6 + $0x1f8] sm:$0xff] }
  0x8d   :  { %625 = vmatprep.subr.bf16.mxu0 %v3085_v2  ;;  %668 = vmatprep.subr.bf16.mxu1 %v3087_v16  ;;  %v3134_v2 = vcombine.low %v164_v57, %v168_v58  ;;  %v3143_v4 = vcombine.high %v172_v61, %v176_v63  ;;  %v3540_v14 = vld [vmem:[#allocation9 + $0x40] ss:$16 sps:$4 sm:$0xff]   ;;  %v3537_v16 = vld [vmem:[#allocation9 + $0x28] ss:$16 sps:$4 sm:$0xff]   ;;  %v3590_v42 = vld [vmem:[#allocation9 + $0x144] ss:$16 sps:$4 sm:$0xff]  }
  0x8e   :  { %v3596_v45 = vld [vmem:[#allocation9 + $0x164] ss:$16 sps:$4 sm:$0xff]   ;;  %v3603_v57 = vld [vmem:[#allocation9 + $0x188] ss:$16 sps:$4 sm:$0xff]   ;;  %v3611_v58 = vld [vmem:[#allocation9 + $0x1ac] ss:$16 sps:$4 sm:$0xff]  }
  0x8f   :  { %572 = vmatmul.mubr.bf16.vlgmr.msra.gmra.mrb[0].mxu0 %v4235_v7  ;;  %615 = vmatmul.mubr.bf16.vlgmr.msra.gmra.mrb[0].mxu1 %v4235_v7  ;;  %v3602_v49 = vld [vmem:[#allocation9 + $0x184] ss:$16 sps:$4 sm:$0xff]  }
  0x90   :  { %626 = vmatpush1.bf16.msra.mxu0 %v3084_v9  ;;  %657 = vmatprep.mubr.bf16.mxu0 %v4120_v6  ;;  %v3142_v9 = vcombine.low %v172_v61, %v176_v63  ;;  %v3608_v53 = vld [vmem:[#allocation9 + $0x1a4] ss:$16 sps:$4 sm:$0xff]   ;;  %v3612_v61 = vld [vmem:[#allocation9 + $0x1c0] ss:$16 sps:$4 sm:$0xff]  }
  0x91   :  { %627 = vmatprep.subr.bf16.mxu0 %v3093_v12  ;;  %669 = vmatpush1.bf16.msra.mxu1 %v3086_v23  ;;  %v3531_v12 = vld [vmem:[#allocation9 + $0x8] ss:$16 sps:$4 sm:$0xff]   ;;  %v3560_v23 = vld [vmem:[#allocation9 + $0xa4] ss:$16 sps:$4 sm:$0xff]  }
  0x92   :  { %700 = vmatprep.mubr.bf16.mxu1 %v4120_v6  ;;  %670 = vmatprep.subr.bf16.mxu1 %v3095_v24  ;;  %v3125_v6 = vcombine.high %v155_v37, %v159_v38  ;;  %v3549_v24 = vld [vmem:[#allocation9 + $0x68] ss:$16 sps:$4 sm:$0xff]   ;;  %v3576_v37 = vld [vmem:[#allocation9 + $0x100] ss:$16 sps:$4 sm:$0xff]   ;;  %v3584_v38 = vld [vmem:[#allocation9 + $0x124] ss:$16 sps:$4 sm:$0xff]  }
  0x93   :  { %v3620_v63 = vld [vmem:[#allocation9 + $0x1e4] ss:$16 sps:$4 sm:$0xff]  }
  0x94   :  { %628 = vmatpush1.bf16.msra.mxu0 %v3092_v17  ;;  %v3545_v17 = vld [vmem:[#allocation9 + $0x4c] ss:$16 sps:$4 sm:$0xff]  }
  0x95   :  { %629 = vmatprep.subr.bf16.mxu0 %v3101_v20  ;;  %671 = vmatpush1.bf16.msra.mxu1 %v3094_v31  ;;  %v3543_v20 = vld [vmem:[#allocation9 + $0x48] ss:$16 sps:$4 sm:$0xff]  }
  0x96   :  { %672 = vmatprep.subr.bf16.mxu1 %v3103_v32  ;;  %v3561_v31 = vld [vmem:[#allocation9 + $0xa8] ss:$16 sps:$4 sm:$0xff]   ;;  %v3569_v32 = vld [vmem:[#allocation9 + $0xcc] ss:$16 sps:$4 sm:$0xff]  }
  0x98   :  { %630 = vmatpush1.bf16.msra.mxu0 %v3100_v25  ;;  %v3557_v25 = vld [vmem:[#allocation9 + $0x8c] ss:$16 sps:$4 sm:$0xff]  }
  0x99   :  { %631 = vmatprep.subr.bf16.mxu0 %v3109_v28  ;;  %673 = vmatpush1.bf16.msra.mxu1 %v3102_v39  ;;  %v3563_v28 = vld [vmem:[#allocation9 + $0xac] ss:$16 sps:$4 sm:$0xff]   ;;  %v3573_v39 = vld [vmem:[#allocation9 + $0xe8] ss:$16 sps:$4 sm:$0xff]  }
  0x9a   :  { %674 = vmatprep.subr.bf16.mxu1 %v3111_v40  ;;  %v3581_v40 = vld [vmem:[#allocation9 + $0x10c] ss:$16 sps:$4 sm:$0xff]  }
  0x9c   :  { %632 = vmatpush1.bf16.msra.mxu0 %v3108_v33  ;;  %v3570_v33 = vld [vmem:[#allocation9 + $0xe0] ss:$16 sps:$4 sm:$0xff]  }
  0x9d   :  { %633 = vmatprep.subr.bf16.mxu0 %v3117_v36  ;;  %675 = vmatpush1.bf16.msra.mxu1 %v3110_v46  ;;  %v3575_v36 = vld [vmem:[#allocation9 + $0xec] ss:$16 sps:$4 sm:$0xff]   ;;  %v3585_v46 = vld [vmem:[#allocation9 + $0x128] ss:$16 sps:$4 sm:$0xff]  }
  0x9e   :  { %676 = vmatprep.subr.bf16.mxu1 %v3119_v47  ;;  %v3593_v47 = vld [vmem:[#allocation9 + $0x14c] ss:$16 sps:$4 sm:$0xff]  }
  0xa0   :  { %634 = vmatpush1.bf16.msra.mxu0 %v3116_v41  ;;  %v3582_v41 = vld [vmem:[#allocation9 + $0x120] ss:$16 sps:$4 sm:$0xff]  }
  0xa1   :  { %635 = vmatprep.subr.bf16.mxu0 %v3125_v6  ;;  %677 = vmatpush1.bf16.msra.mxu1 %v3118_v54  ;;  %v3587_v6 = vld [vmem:[#allocation9 + $0x12c] ss:$16 sps:$4 sm:$0xff]   ;;  %v3597_v54 = vld [vmem:[#allocation9 + $0x168] ss:$16 sps:$4 sm:$0xff]  }
  0xa2   :  { %678 = vmatprep.subr.bf16.mxu1 %v3127_v55  ;;  %v3605_v55 = vld [vmem:[#allocation9 + $0x18c] ss:$16 sps:$4 sm:$0xff]  }
  0xa4   :  { %636 = vmatpush1.bf16.msra.mxu0 %v3124_v48  ;;  %v3594_v48 = vld [vmem:[#allocation9 + $0x160] ss:$16 sps:$4 sm:$0xff]  }
  0xa5   :  { %637 = vmatprep.subr.bf16.mxu0 %v3133_v51  ;;  %679 = vmatpush1.bf16.msra.mxu1 %v3126_v60  ;;  %v3599_v51 = vld [vmem:[#allocation9 + $0x16c] ss:$16 sps:$4 sm:$0xff]   ;;  %v3609_v60 = vld [vmem:[#allocation9 + $0x1a8] ss:$16 sps:$4 sm:$0xff]  }
  0xa6   :  { %680 = vmatprep.subr.bf16.mxu1 %v3135_v62  ;;  %v3617_v62 = vld [vmem:[#allocation9 + $0x1cc] ss:$16 sps:$4 sm:$0xff]  }
  0xa8   :  { %638 = vmatpush1.bf16.msra.mxu0 %v3132_v56  ;;  %v3606_v56 = vld [vmem:[#allocation9 + $0x1a0] ss:$16 sps:$4 sm:$0xff]  }
  0xa9   :  { %639 = vmatprep.subr.bf16.mxu0 %v3141_v59  ;;  %681 = vmatpush1.bf16.msra.mxu1 %v3134_v2  ;;  %v3614_v59 = vld [vmem:[#allocation9 + $0x1c4] ss:$16 sps:$4 sm:$0xff]   ;;  %v3623_v2 = vld [vmem:[#allocation9 + $0x1ec] ss:$16 sps:$4 sm:$0xff]  }
  0xaa   :  { %682 = vmatprep.subr.bf16.mxu1 %v3143_v4  ;;  %v3621_v4 = vld [vmem:[#allocation9 + $0x1e8] ss:$16 sps:$4 sm:$0xff]  }
  0xac   :  { %640 = vmatpush1.bf16.msra.mxu0 %v3140_v1  ;;  %v3618_v1 = vld [vmem:[#allocation9 + $0x1e0] ss:$16 sps:$4 sm:$0xff]  }
  0xad   :  { %2327 = vmatprep.subr.bf16.mxu0 %v3530_v0  ;;  %683 = vmatpush1.bf16.msra.mxu1 %v3142_v9  ;;  %v3615_v0 = vld [vmem:[#allocation9 + $0x1c8] ss:$16 sps:$4 sm:$0xff]  }
  0xae   :  { %2499 = vmatprep.subr.bf16.mxu1 %v3533_v8  ;;  %v179_v8 = vlaneseq }
  0xaf   :  { %658 = vmatmul.mubr.bf16.vlgmr.msra.gmra.mrb[4].mxu0 %v4235_v7 }
  0xb0   :  { %2328 = vmatpush1.bf16.msra.mxu0 %v3528_v3  ;;  %701 = vmatmul.mubr.bf16.vlgmr.msra.gmra.mrb[4].mxu1 %v4235_v7  ;;  %v3558_v7 = vld [vmem:[#allocation9 + $0xa0] ss:$16 sps:$4 sm:$0xff]   ;;  %v3626_v3 = vld [vmem:[#allocation9 + $0x204] ss:$16 sps:$4 sm:$0xff]   ;;  %v4243_v9 = vshrl.u32 %v179_v8, 7 }
  0xb1   :  { %2329 = vmatprep.subr.bf16.mxu0 %v3536_v5  ;;  %2500 = vmatpush1.bf16.msra.mxu1 %v3531_v12  ;;  %v3629_v5 = vld [vmem:[#allocation9 + $0x20c] ss:$16 sps:$4 sm:$0xff]   ;;  %v3648_v8 = vld [vmem:[#allocation9 + $0x280] ss:$16 sps:$4 sm:$0xff]  }
  0xb2   :  { %2501 = vmatprep.subr.bf16.mxu1 %v3539_v13  ;;  %v185_v12 = vsub.s32 1, %v4243_v9 }
  0xb4   :  { %2330 = vmatpush1.bf16.msra.mxu0 %v3534_v10  ;;  %v181_v10 = vsub.s32 0, %v4243_v9 }
  0xb5   :  { %2331 = vmatprep.subr.bf16.mxu0 %v3542_v11  ;;  %2502 = vmatpush1.bf16.msra.mxu1 %v3537_v16  ;;  %v4246_v11 = vld [vmem:[#allocation8] sm:$0xff] }
  0xb6   :  { %2503 = vmatprep.subr.bf16.mxu1 %v3545_v17  ;;  %v182_v13 = vrot.slane %v4246_v11, %v181_v10  ;;  %v4256_v17 = vstv %s727_s5 }
  0xb8   :  { %2332 = vmatpush1.bf16.msra.mxu0 %v3540_v14  ;;  %v186_v14 = vrot.slane %v4246_v11, %v185_v12 }
  0xb9   :  { %2333 = vmatprep.subr.bf16.mxu0 %v3548_v15  ;;  %2504 = vmatpush1.bf16.msra.mxu1 %v3543_v20  ;;  %v189_v15 = vsub.s32 2, %v4243_v9 }
  0xba   :  { %2505 = vmatprep.subr.bf16.mxu1 %v3551_v21 }
  0xbc   :  { %2334 = vmatpush1.bf16.msra.mxu0 %v3546_v18  ;;  %v193_v18 = vsub.s32 3, %v4243_v9 }
  0xbd   :  { %2335 = vmatprep.subr.bf16.mxu0 %v3554_v19  ;;  %2506 = vmatpush1.bf16.msra.mxu1 %v3549_v24 }
  0xbe   :  { %2507 = vmatprep.subr.bf16.mxu1 %v3557_v25 }
  0xc0   :  { %2336 = vmatpush1.bf16.msra.mxu0 %v3552_v22 }
  0xc1   :  { %2337 = vmatprep.subr.bf16.mxu0 %v3560_v23  ;;  %2508 = vmatpush1.bf16.msra.mxu1 %v3555_v27 }
  0xc2   :  { %2509 = vmatprep.subr.bf16.mxu1 %v3563_v28  ;;  %v194_v28 = vrot.slane %v4246_v11, %v193_v18 }
  0xc4   :  { %2338 = vmatpush1.bf16.msra.mxu0 %v3558_v7  ;;  %v190_v7 = vrot.slane %v4246_v11, %v189_v15 }
  0xc5   :  { %2339 = vmatprep.subr.bf16.mxu0 %v3566_v26  ;;  %2510 = vmatpush1.bf16.msra.mxu1 %v3561_v31 }
  0xc6   :  { %2511 = vmatprep.subr.bf16.mxu1 %v3569_v32 }
  0xc8   :  { %2340 = vmatpush1.bf16.msra.mxu0 %v3564_v29 }
  0xc9   :  { %2341 = vmatprep.subr.bf16.mxu0 %v3572_v30  ;;  %2512 = vmatpush1.bf16.msra.mxu1 %v3567_v35 }
  0xca   :  { %2513 = vmatprep.subr.bf16.mxu1 %v3575_v36 }
  0xcc   :  { %2342 = vmatpush1.bf16.msra.mxu0 %v3570_v33 }
  0xcd   :  { %2343 = vmatprep.subr.bf16.mxu0 %v3578_v34  ;;  %2514 = vmatpush1.bf16.msra.mxu1 %v3573_v39 }
  0xce   :  { %2515 = vmatprep.subr.bf16.mxu1 %v3581_v40 }
  0xd0   :  { %2344 = vmatpush1.bf16.msra.mxu0 %v3576_v37 }
  0xd1   :  { %2345 = vmatprep.subr.bf16.mxu0 %v3584_v38  ;;  %2516 = vmatpush1.bf16.msra.mxu1 %v3579_v43  ;;  %v3627_v43 = vld [vmem:[#allocation9 + $0x208] ss:$16 sps:$4 sm:$0xff]  }
  0xd2   :  { %2517 = vmatprep.subr.bf16.mxu1 %v3587_v6 }
  0xd4   :  { %2346 = vmatpush1.bf16.msra.mxu0 %v3582_v41 }
  0xd5   :  { %2347 = vmatprep.subr.bf16.mxu0 %v3590_v42  ;;  %2518 = vmatpush1.bf16.msra.mxu1 %v3585_v46  ;;  %v3624_v42 = vld [vmem:[#allocation9 + $0x200] ss:$16 sps:$4 sm:$0xff]   ;;  %v3632_v46 = vld [vmem:[#allocation9 + $0x224] ss:$16 sps:$4 sm:$0xff]  }
  0xd6   :  { %2519 = vmatprep.subr.bf16.mxu1 %v3593_v47  ;;  %v3635_v47 = vld [vmem:[#allocation9 + $0x22c] ss:$16 sps:$4 sm:$0xff]  }
  0xd8   :  { %2348 = vmatpush1.bf16.msra.mxu0 %v3588_v44 }
  0xd9   :  { %2349 = vmatprep.subr.bf16.mxu0 %v3596_v45  ;;  %2520 = vmatpush1.bf16.msra.mxu1 %v3591_v50 }
  0xda   :  { %2521 = vmatprep.subr.bf16.mxu1 %v3599_v51 }
  0xdc   :  { %2350 = vmatpush1.bf16.msra.mxu0 %v3594_v48 }
  0xdd   :  { %2351 = vmatprep.subr.bf16.mxu0 %v3602_v49  ;;  %2522 = vmatpush1.bf16.msra.mxu1 %v3597_v54  ;;  %v3630_v54 = vld [vmem:[#allocation9 + $0x220] ss:$16 sps:$4 sm:$0xff]  }
  0xde   :  { %2523 = vmatprep.subr.bf16.mxu1 %v3605_v55  ;;  %v3633_v55 = vld [vmem:[#allocation9 + $0x228] ss:$16 sps:$4 sm:$0xff]  }
  0xe0   :  { %2352 = vmatpush1.bf16.msra.mxu0 %v3600_v52 }
  0xe1   :  { %2353 = vmatprep.subr.bf16.mxu0 %v3608_v53  ;;  %2524 = vmatpush1.bf16.msra.mxu1 %v3603_v57  ;;  %v3638_v57 = vld [vmem:[#allocation9 + $0x244] ss:$16 sps:$4 sm:$0xff]  }
  0xe2   :  { %2525 = vmatprep.subr.bf16.mxu1 %v3611_v58  ;;  %v3641_v58 = vld [vmem:[#allocation9 + $0x24c] ss:$16 sps:$4 sm:$0xff]  }
  0xe4   :  { %2354 = vmatpush1.bf16.msra.mxu0 %v3606_v56 }
  0xe5   :  { %2355 = vmatprep.subr.bf16.mxu0 %v3614_v59  ;;  %2526 = vmatpush1.bf16.msra.mxu1 %v3609_v60 }
  0xe6   :  { %2527 = vmatprep.subr.bf16.mxu1 %v3617_v62  ;;  %v3636_v62 = vld [vmem:[#allocation9 + $0x240] ss:$16 sps:$4 sm:$0xff]  }
  0xe8   :  { %2356 = vmatpush1.bf16.msra.mxu0 %v3612_v61 }
  0xe9   :  { %2357 = vmatprep.subr.bf16.mxu0 %v3620_v63  ;;  %2528 = vmatpush1.bf16.msra.mxu1 %v3615_v0  ;;  %v3639_v63 = vld [vmem:[#allocation9 + $0x248] ss:$16 sps:$4 sm:$0xff]   ;;  %v3644_v0 = vld [vmem:[#allocation9 + $0x264] ss:$16 sps:$4 sm:$0xff]  }
  0xea   :  { %2529 = vmatprep.subr.bf16.mxu1 %v3623_v2  ;;  %v3642_v2 = vld [vmem:[#allocation9 + $0x260] ss:$16 sps:$4 sm:$0xff]  }
  0xec   :  { %2358 = vmatpush1.bf16.msra.mxu0 %v3618_v1  ;;  %v3647_v1 = vld [vmem:[#allocation9 + $0x26c] ss:$16 sps:$4 sm:$0xff]  }
  0xed   :  { %2370 = vmatprep.subr.bf16.mxu0 %v3626_v3  ;;  %2530 = vmatpush1.bf16.msra.mxu1 %v3621_v4  ;;  %v3645_v3 = vld [vmem:[#allocation9 + $0x268] ss:$16 sps:$4 sm:$0xff]   ;;  %v3650_v4 = vld [vmem:[#allocation9 + $0x284] ss:$16 sps:$4 sm:$0xff]  }
  0xee   :  { %2542 = vmatprep.subr.bf16.mxu1 %v3629_v5  ;;  %v3653_v5 = vld [vmem:[#allocation9 + $0x28c] ss:$16 sps:$4 sm:$0xff]  }
 0x162   :  { %v573_v16 = vpop.f32.mrb[0].mxu0  ;;  %v616_v31 = vpop.f32.mrb[0].mxu1 }
 0x163   :  { %v574_v19 = vadd.f32 %v573_v16, %v182_v13  ;;  %v575_v20 = vpop.f32.mrb[1].mxu0  ;;  %v617_v34 = vadd.f32 %v616_v31, %v190_v7  ;;  %v618_v35 = vpop.f32.mrb[1].mxu1  ;;  %v3656_v16 = vld [vmem:[#allocation9 + $0x2a4] ss:$16 sps:$4 sm:$0xff]  }
 0x164   :  { %v576_v21 = vadd.f32 %v575_v20, %v186_v14  ;;  %v577_v22 = vpop.f32.mrb[2].mxu0  ;;  %v619_v39 = vadd.f32 %v618_v35, %v194_v28  ;;  %v620_v40 = vpop.f32.mrb[2].mxu1  ;;  %v201_v20 = vsub.s32 5, %v4243_v9 }
 0x165   :  { %v729_v23 = vmul.f32 %v4256_v17, %v574_v19  ;;  %v578_v24 = vadd.f32 %v577_v22, %v182_v13  ;;  %v579_v25 = vpop.f32.mrb[3].mxu0  ;;  %vm711_vm0 = vcmp.gt.f32.partialorder %v574_v19, 0.0  ;;  %vm713_vm4 = vcmp.gt.f32.partialorder %v617_v34, 0.0  ;;  %v622_v45 = vpop.f32.mrb[3].mxu1  ;;  %v3651_v13 = vld [vmem:[#allocation9 + $0x288] ss:$16 sps:$4 sm:$0xff]  }
 0x166   :  { %v730_v26 = vmul.f32 %v4256_v17, %v576_v21  ;;  %v580_v27 = vadd.f32 %v579_v25, %v186_v14  ;;  %vm712_vm1 = vcmp.gt.f32.partialorder %v576_v21, 0.0  ;;  %v731_v6 = vmul.f32 %v4256_v17, %v617_v34  ;;  %v3657_v22 = vld [vmem:[#allocation9 + $0x2a8] ss:$16 sps:$4 sm:$0xff]   ;;  %v3665_v25 = vld [vmem:[#allocation9 + $0x2cc] ss:$16 sps:$4 sm:$0xff]  }
 0x167   :  { %vm719_vm2 = vcmp.gt.f32.partialorder %v578_v24, 0.0  ;;  %v737_v29 = vmul.f32 %v4256_v17, %v578_v24  ;;  %v745_v32 = vsel %vm711_vm0, %v574_v19, %v729_v23  ;;  %v621_v44 = vadd.f32 %v620_v40, %v190_v7  ;;  %v3659_v19 = vld [vmem:[#allocation9 + $0x2ac] ss:$16 sps:$4 sm:$0xff]  }
 0x168   :  { %vm720_vm3 = vcmp.gt.f32.partialorder %v580_v27, 0.0  ;;  %v738_v30 = vmul.f32 %v4256_v17, %v580_v27  ;;  %v746_v37 = vsel %vm712_vm1, %v576_v21, %v730_v26  ;;  %vm714_vm5 = vcmp.gt.f32.partialorder %v619_v39, 0.0  ;;  %v3654_v21 = vld [vmem:[#allocation9 + $0x2a0] ss:$16 sps:$4 sm:$0xff]  }
 0x169   :  { %v753_v33 = vsel %vm719_vm2, %v578_v24, %v737_v29  ;;  %v732_v48 = vmul.f32 %v4256_v17, %v619_v39  ;;  %v623_v49 = vadd.f32 %v622_v45, %v194_v28  ;;  %v747_v50 = vsel %vm713_vm4, %v617_v34, %v731_v6  ;;  %v3662_v24 = vld [vmem:[#allocation9 + $0x2c4] ss:$16 sps:$4 sm:$0xff]   ;;  %v3660_v29 = vld [vmem:[#allocation9 + $0x2c0] ss:$16 sps:$4 sm:$0xff]   ;;  %v3671_v34 = vld [vmem:[#allocation9 + $0x2ec] ss:$16 sps:$4 sm:$0xff]  }
 0x16a   :  { %v761_v36 = vpack.c.bf16 %v753_v33, %v745_v32  ;;  %v754_v38 = vsel %vm720_vm3, %v580_v27, %v738_v30  ;;  %vm721_vm6 = vcmp.gt.f32.partialorder %v621_v44, 0.0  ;;  %v739_v51 = vmul.f32 %v4256_v17, %v621_v44  ;;  %v3663_v30 = vld [vmem:[#allocation9 + $0x2c8] ss:$16 sps:$4 sm:$0xff]   ;;  %v3668_v33 = vld [vmem:[#allocation9 + $0x2e4] ss:$16 sps:$4 sm:$0xff]  }
 0x16b   :  { %v762_v41 = vpack.c.bf16 %v754_v38, %v746_v37  ;;  %vm722_vm7 = vcmp.gt.f32.partialorder %v623_v49, 0.0  ;;  %v740_v52 = vmul.f32 %v4256_v17, %v623_v49  ;;  %v748_v53 = vsel %vm714_vm5, %v619_v39, %v732_v48  ;;  %v3666_v6 = vld [vmem:[#allocation9 + $0x2e0] ss:$16 sps:$4 sm:$0xff]   ;;  %v3677_v48 = vld [vmem:[#allocation9 + $0x30c] ss:$16 sps:$4 sm:$0xff]  }
 0x16c   :  { %v755_v56 = vsel %vm721_vm6, %v621_v44, %v739_v51  ;;  %v197_v14 = vsub.s32 4, %v4243_v9  ;;  %v202_v7 = vrot.slane %v4246_v11, %v201_v20  ;;  %v205_v26 = vsub.s32 6, %v4243_v9  ;;  %v3669_v44 = vld [vmem:[#allocation9 + $0x2e8] ss:$16 sps:$4 sm:$0xff]  }
 0x16d   :  { %2359 = vmatprep.mubr.bf16.mxu0 %v762_v41  ;;  %2531 = vmatprep.mubr.bf16.mxu1 %v762_v41  ;;  %v4273_v59 = vpack.c.bf16 %v755_v56, %v747_v50  ;;  %v756_v60 = vsel %vm722_vm7, %v623_v49, %v740_v52  ;;  %v209_v28 = vsub.s32 7, %v4243_v9 }
 0x16e   :  { %2360 = vmatmul.mubr.bf16.vlgmr.msra.gmra.mrb[8].mxu0 %v761_v36  ;;  %2532 = vmatmul.mubr.bf16.vlgmr.msra.gmra.mrb[8].mxu1 %v761_v36  ;;  %v764_v61 = vpack.c.bf16 %v756_v60, %v748_v53  ;;  %v198_v23 = vrot.slane %v4246_v11, %v197_v14  ;;  %v206_v40 = vrot.slane %v4246_v11, %v205_v26  ;;  %v3675_v60 = vld [vmem:[#allocation9 + $0x308] ss:$16 sps:$4 sm:$0xff]  }
 0x16f   :  { %2371 = vmatpush1.bf16.msra.mxu0 %v3624_v42  ;;  %2543 = vmatpush1.bf16.msra.mxu1 %v3627_v43  ;;  %v210_v43 = vrot.slane %v4246_v11, %v209_v28  ;;  %v3687_v26 = vld [vmem:[#allocation9 + $0x348] ss:$16 sps:$4 sm:$0xff]   ;;  %v3690_v28 = vld [vmem:[#allocation9 + $0x360] ss:$16 sps:$4 sm:$0xff]  }
 0x170   :  { %2372 = vmatprep.subr.bf16.mxu0 %v3632_v46  ;;  %2544 = vmatprep.subr.bf16.mxu1 %v3635_v47  ;;  %v3674_v47 = vld [vmem:[#allocation9 + $0x304] ss:$16 sps:$4 sm:$0xff]  }
 0x171   :  { %2402 = vmatprep.mubr.bf16.mxu0 %v764_v61  ;;  %2574 = vmatprep.mubr.bf16.mxu1 %v764_v61 }
 0x173   :  { %2373 = vmatpush1.bf16.msra.mxu0 %v3630_v54  ;;  %2545 = vmatpush1.bf16.msra.mxu1 %v3633_v55 }
 0x174   :  { %2374 = vmatprep.subr.bf16.mxu0 %v3638_v57  ;;  %2546 = vmatprep.subr.bf16.mxu1 %v3641_v58  ;;  %v3672_v58 = vld [vmem:[#allocation9 + $0x300] ss:$16 sps:$4 sm:$0xff]  }
 0x177   :  { %2375 = vmatpush1.bf16.msra.mxu0 %v3636_v62  ;;  %2547 = vmatpush1.bf16.msra.mxu1 %v3639_v63 }
 0x178   :  { %2376 = vmatprep.subr.bf16.mxu0 %v3644_v0  ;;  %2548 = vmatprep.subr.bf16.mxu1 %v3647_v1  ;;  %v3680_v1 = vld [vmem:[#allocation9 + $0x324] ss:$16 sps:$4 sm:$0xff]  }
 0x17b   :  { %2377 = vmatpush1.bf16.msra.mxu0 %v3642_v2  ;;  %2549 = vmatpush1.bf16.msra.mxu1 %v3645_v3  ;;  %v3683_v2 = vld [vmem:[#allocation9 + $0x32c] ss:$16 sps:$4 sm:$0xff]  }
 0x17c   :  { %2378 = vmatprep.subr.bf16.mxu0 %v3650_v4  ;;  %2550 = vmatprep.subr.bf16.mxu1 %v3653_v5 }
 0x17f   :  { %2379 = vmatpush1.bf16.msra.mxu0 %v3648_v8  ;;  %2551 = vmatpush1.bf16.msra.mxu1 %v3651_v13 }
 0x180   :  { %2380 = vmatprep.subr.bf16.mxu0 %v3656_v16  ;;  %2552 = vmatprep.subr.bf16.mxu1 %v3659_v19  ;;  %v3678_v16 = vld [vmem:[#allocation9 + $0x320] ss:$16 sps:$4 sm:$0xff]   ;;  %v3681_v19 = vld [vmem:[#allocation9 + $0x328] ss:$16 sps:$4 sm:$0xff]  }
 0x182   :  { %v659_v27 = vpop.f32.mrb[4].mxu0 }
 0x183   :  { %2381 = vmatpush1.bf16.msra.mxu0 %v3654_v21  ;;  %2553 = vmatpush1.bf16.msra.mxu1 %v3657_v22  ;;  %v660_v31 = vadd.f32 %v659_v27, %v198_v23  ;;  %v661_v32 = vpop.f32.mrb[5].mxu0  ;;  %v702_v51 = vpop.f32.mrb[4].mxu1  ;;  %v3686_v21 = vld [vmem:[#allocation9 + $0x344] ss:$16 sps:$4 sm:$0xff]   ;;  %v3689_v22 = vld [vmem:[#allocation9 + $0x34c] ss:$16 sps:$4 sm:$0xff]  }
 0x184   :  { %2382 = vmatprep.subr.bf16.mxu0 %v3662_v24  ;;  %2554 = vmatprep.subr.bf16.mxu1 %v3665_v25  ;;  %v662_v35 = vadd.f32 %v661_v32, %v202_v7  ;;  %v663_v36 = vpop.f32.mrb[6].mxu0  ;;  %v703_v11 = vadd.f32 %v702_v51, %v206_v40  ;;  %v704_v53 = vpop.f32.mrb[5].mxu1  ;;  %v3695_v27 = vld [vmem:[#allocation9 + $0x36c] ss:$16 sps:$4 sm:$0xff]   ;;  %v3696_v32 = vld [vmem:[#allocation9 + $0x380] ss:$16 sps:$4 sm:$0xff]  }
 0x185   :  { %vm715_vm8 = vcmp.gt.f32.partialorder %v660_v31, 0.0  ;;  %v733_v37 = vmul.f32 %v4256_v17, %v660_v31  ;;  %v664_v38 = vadd.f32 %v663_v36, %v198_v23  ;;  %v665_v39 = vpop.f32.mrb[7].mxu0  ;;  %v705_v56 = vadd.f32 %v704_v53, %v210_v43  ;;  %v706_v57 = vpop.f32.mrb[6].mxu1  ;;  %v3702_v36 = vld [vmem:[#allocation9 + $0x3a0] ss:$16 sps:$4 sm:$0xff]  }
 0x186   :  { %vm716_vm9 = vcmp.gt.f32.partialorder %v662_v35, 0.0  ;;  %v734_v41 = vmul.f32 %v4256_v17, %v662_v35  ;;  %v666_v42 = vadd.f32 %v665_v39, %v202_v7  ;;  %vm717_vm12 = vcmp.gt.f32.partialorder %v703_v11, 0.0  ;;  %v708_v0 = vpop.f32.mrb[7].mxu1  ;;  %v3684_v7 = vld [vmem:[#allocation9 + $0x340] ss:$16 sps:$4 sm:$0xff]  }
 0x187   :  { %2383 = vmatpush1.bf16.msra.mxu0 %v3660_v29  ;;  %2555 = vmatpush1.bf16.msra.mxu1 %v3663_v30  ;;  %v749_v45 = vsel %vm715_vm8, %v660_v31, %v733_v37  ;;  %vm723_vm10 = vcmp.gt.f32.partialorder %v664_v38, 0.0  ;;  %v741_v46 = vmul.f32 %v4256_v17, %v664_v38  ;;  %v735_v62 = vmul.f32 %v4256_v17, %v703_v11  ;;  %v3693_v29 = vld [vmem:[#allocation9 + $0x368] ss:$16 sps:$4 sm:$0xff]   ;;  %v3698_v30 = vld [vmem:[#allocation9 + $0x384] ss:$16 sps:$4 sm:$0xff]  }
 0x188   :  { %2384 = vmatprep.subr.bf16.mxu0 %v3668_v33  ;;  %2556 = vmatprep.subr.bf16.mxu1 %v3671_v34  ;;  %vm724_vm11 = vcmp.gt.f32.partialorder %v666_v42, 0.0  ;;  %v742_v49 = vmul.f32 %v4256_v17, %v666_v42  ;;  %v750_v50 = vsel %vm716_vm9, %v662_v35, %v734_v41  ;;  %v707_v63 = vadd.f32 %v706_v57, %v206_v40  ;;  %v3701_v31 = vld [vmem:[#allocation9 + $0x38c] ss:$16 sps:$4 sm:$0xff]   ;;  %v3699_v33 = vld [vmem:[#allocation9 + $0x388] ss:$16 sps:$4 sm:$0xff]  }
 0x189   :  { %v757_v52 = vsel %vm723_vm10, %v664_v38, %v741_v46  ;;  %vm718_vm13 = vcmp.gt.f32.partialorder %v705_v56, 0.0  ;;  %v736_v3 = vmul.f32 %v4256_v17, %v705_v56  ;;  %v709_v4 = vadd.f32 %v708_v0, %v210_v43  ;;  %v3704_v34 = vld [vmem:[#allocation9 + $0x3a4] ss:$16 sps:$4 sm:$0xff]   ;;  %v3707_v35 = vld [vmem:[#allocation9 + $0x3ac] ss:$16 sps:$4 sm:$0xff]  }
 0x18a   :  { %v4288_v54 = vpack.c.bf16 %v757_v52, %v749_v45  ;;  %v758_v55 = vsel %vm724_vm11, %v666_v42, %v742_v49  ;;  %v751_v5 = vsel %vm717_vm12, %v703_v11, %v735_v62  ;;  %vm725_vm14 = vcmp.gt.f32.partialorder %v707_v63, 0.0  ;;  %v3705_v37 = vld [vmem:[#allocation9 + $0x3a8] ss:$16 sps:$4 sm:$0xff]   ;;  %v3710_v38 = vld [vmem:[#allocation9 + $0x3c4] ss:$16 sps:$4 sm:$0xff]  }
 0x18b   :  { %2385 = vmatpush1.bf16.msra.mxu0 %v3666_v6  ;;  %2557 = vmatpush1.bf16.msra.mxu1 %v3669_v44  ;;  %v4290_v61 = vpack.c.bf16 %v758_v55, %v750_v50  ;;  %v743_v8 = vmul.f32 %v4256_v17, %v707_v63  ;;  %vm726_vm15 = vcmp.gt.f32.partialorder %v709_v4, 0.0  ;;  %v744_v13 = vmul.f32 %v4256_v17, %v709_v4  ;;  %v3692_v17 = vld [vmem:[#allocation9 + $0x364] ss:$16 sps:$4 sm:$0xff]   ;;  %v3713_v39 = vld [vmem:[#allocation9 + $0x3cc] ss:$16 sps:$4 sm:$0xff]  }
 0x18c   :  { %2386 = vmatprep.subr.bf16.mxu0 %v3674_v47  ;;  %2558 = vmatprep.subr.bf16.mxu1 %v3677_v48  ;;  %v752_v14 = vsel %vm718_vm13, %v705_v56, %v736_v3  ;;  %v3708_v40 = vld [vmem:[#allocation9 + $0x3c0] ss:$16 sps:$4 sm:$0xff]   ;;  %v3711_v41 = vld [vmem:[#allocation9 + $0x3c8] ss:$16 sps:$4 sm:$0xff]   ;;  %v3716_v42 = vld [vmem:[#allocation9 + $0x3e4] ss:$16 sps:$4 sm:$0xff]  }
 0x18d   :  { %v759_v20 = vsel %vm725_vm14, %v707_v63, %v743_v8  ;;  %v760_v24 = vsel %vm726_vm15, %v709_v4, %v744_v13  ;;  %v3719_v43 = vld [vmem:[#allocation9 + $0x3ec] ss:$16 sps:$4 sm:$0xff]   ;;  %v3714_v6 = vld [vmem:[#allocation9 + $0x3e0] ss:$16 sps:$4 sm:$0xff]   ;;  %v3717_v44 = vld [vmem:[#allocation9 + $0x3e8] ss:$16 sps:$4 sm:$0xff]  }
 0x18e   :  { %v4296_v23 = vpack.c.bf16 %v759_v20, %v751_v5  ;;  %v4298_v25 = vpack.c.bf16 %v760_v24, %v752_v14  ;;  %v3722_v45 = vld [vmem:[#allocation9 + $0x404] ss:$16 sps:$4 sm:$0xff]   ;;  %v3725_v46 = vld [vmem:[#allocation9 + $0x40c] ss:$16 sps:$4 sm:$0xff]   ;;  %v3720_v47 = vld [vmem:[#allocation9 + $0x400] ss:$16 sps:$4 sm:$0xff]  }
 0x18f   :  { %2387 = vmatpush1.bf16.msra.mxu0 %v3672_v58  ;;  %2559 = vmatpush1.bf16.msra.mxu1 %v3675_v60  ;;  %v3723_v48 = vld [vmem:[#allocation9 + $0x408] ss:$16 sps:$4 sm:$0xff]   ;;  %v3728_v49 = vld [vmem:[#allocation9 + $0x424] ss:$16 sps:$4 sm:$0xff]   ;;  %v3731_v50 = vld [vmem:[#allocation9 + $0x42c] ss:$16 sps:$4 sm:$0xff]  }
 0x190   :  { %2388 = vmatprep.subr.bf16.mxu0 %v3680_v1  ;;  %2560 = vmatprep.subr.bf16.mxu1 %v3683_v2  ;;  %v3726_v51 = vld [vmem:[#allocation9 + $0x420] ss:$16 sps:$4 sm:$0xff]   ;;  %v3729_v52 = vld [vmem:[#allocation9 + $0x428] ss:$16 sps:$4 sm:$0xff]   ;;  %v3734_v11 = vld [vmem:[#allocation9 + $0x444] ss:$16 sps:$4 sm:$0xff]  }
 0x191   :  { %v3737_v53 = vld [vmem:[#allocation9 + $0x44c] ss:$16 sps:$4 sm:$0xff]   ;;  %v3732_v55 = vld [vmem:[#allocation9 + $0x440] ss:$16 sps:$4 sm:$0xff]   ;;  %v3735_v56 = vld [vmem:[#allocation9 + $0x448] ss:$16 sps:$4 sm:$0xff]  }
 0x192   :  { %v3740_v57 = vld [vmem:[#allocation9 + $0x464] ss:$16 sps:$4 sm:$0xff]   ;;  %v3738_v58 = vld [vmem:[#allocation9 + $0x460] ss:$16 sps:$4 sm:$0xff]   ;;  %v3741_v60 = vld [vmem:[#allocation9 + $0x468] ss:$16 sps:$4 sm:$0xff]  }
 0x193   :  { %2389 = vmatpush1.bf16.msra.mxu0 %v3678_v16  ;;  %2561 = vmatpush1.bf16.msra.mxu1 %v3681_v19  ;;  %v3746_v62 = vld [vmem:[#allocation9 + $0x484] ss:$16 sps:$4 sm:$0xff]   ;;  %v3749_v63 = vld [vmem:[#allocation9 + $0x48c] ss:$16 sps:$4 sm:$0xff]   ;;  %v3744_v0 = vld [vmem:[#allocation9 + $0x480] ss:$16 sps:$4 sm:$0xff]  }
 0x194   :  { %2390 = vmatprep.subr.bf16.mxu0 %v3686_v21  ;;  %2562 = vmatprep.subr.bf16.mxu1 %v3689_v22  ;;  %v3752_v1 = vld [vmem:[#allocation9 + $0x4a4] ss:$16 sps:$4 sm:$0xff]   ;;  %v3755_v2 = vld [vmem:[#allocation9 + $0x4ac] ss:$16 sps:$4 sm:$0xff]   ;;  %v3750_v3 = vld [vmem:[#allocation9 + $0x4a0] ss:$16 sps:$4 sm:$0xff]  }
 0x195   :  { %v3753_v4 = vld [vmem:[#allocation9 + $0x4a8] ss:$16 sps:$4 sm:$0xff]   ;;  %v3758_v5 = vld [vmem:[#allocation9 + $0x4c4] ss:$16 sps:$4 sm:$0xff]   ;;  %v3761_v8 = vld [vmem:[#allocation9 + $0x4cc] ss:$16 sps:$4 sm:$0xff]  }
 0x196   :  { %v3756_v13 = vld [vmem:[#allocation9 + $0x4c0] ss:$16 sps:$4 sm:$0xff]   ;;  %v3759_v14 = vld [vmem:[#allocation9 + $0x4c8] ss:$16 sps:$4 sm:$0xff]   ;;  %v3764_v16 = vld [vmem:[#allocation9 + $0x4e4] ss:$16 sps:$4 sm:$0xff]  }
 0x197   :  { %2391 = vmatpush1.bf16.msra.mxu0 %v3684_v7  ;;  %2563 = vmatpush1.bf16.msra.mxu1 %v3687_v26  ;;  %v3767_v19 = vld [vmem:[#allocation9 + $0x4ec] ss:$16 sps:$4 sm:$0xff]   ;;  %v3762_v20 = vld [vmem:[#allocation9 + $0x4e0] ss:$16 sps:$4 sm:$0xff]   ;;  %v3765_v21 = vld [vmem:[#allocation9 + $0x4e8] ss:$16 sps:$4 sm:$0xff]  }
 0x198   :  { %2392 = vmatprep.subr.bf16.mxu0 %v3692_v17  ;;  %2564 = vmatprep.subr.bf16.mxu1 %v3695_v27  ;;  %v3770_v22 = vld [vmem:[#allocation9 + $0x504] ss:$16 sps:$4 sm:$0xff]   ;;  %v3773_v24 = vld [vmem:[#allocation9 + $0x50c] ss:$16 sps:$4 sm:$0xff]   ;;  %v3768_v7 = vld [vmem:[#allocation9 + $0x500] ss:$16 sps:$4 sm:$0xff]  }
 0x199   :  { %v3771_v26 = vld [vmem:[#allocation9 + $0x508] ss:$16 sps:$4 sm:$0xff]   ;;  %v3776_v17 = vld [vmem:[#allocation9 + $0x524] ss:$16 sps:$4 sm:$0xff]   ;;  %v3779_v27 = vld [vmem:[#allocation9 + $0x52c] ss:$16 sps:$4 sm:$0xff]  }
 0x19b   :  { %2393 = vmatpush1.bf16.msra.mxu0 %v3690_v28  ;;  %2565 = vmatpush1.bf16.msra.mxu1 %v3693_v29  ;;  %v3774_v28 = vld [vmem:[#allocation9 + $0x520] ss:$16 sps:$4 sm:$0xff]   ;;  %v3777_v29 = vld [vmem:[#allocation9 + $0x528] ss:$16 sps:$4 sm:$0xff]  }
 0x19c   :  { %2394 = vmatprep.subr.bf16.mxu0 %v3698_v30  ;;  %2566 = vmatprep.subr.bf16.mxu1 %v3701_v31  ;;  %v3782_v30 = vld [vmem:[#allocation9 + $0x544] ss:$16 sps:$4 sm:$0xff]   ;;  %v3785_v31 = vld [vmem:[#allocation9 + $0x54c] ss:$16 sps:$4 sm:$0xff]  }
 0x19f   :  { %2395 = vmatpush1.bf16.msra.mxu0 %v3696_v32  ;;  %2567 = vmatpush1.bf16.msra.mxu1 %v3699_v33  ;;  %v3780_v32 = vld [vmem:[#allocation9 + $0x540] ss:$16 sps:$4 sm:$0xff]   ;;  %v3783_v33 = vld [vmem:[#allocation9 + $0x548] ss:$16 sps:$4 sm:$0xff]  }
 0x1a0   :  { %2396 = vmatprep.subr.bf16.mxu0 %v3704_v34  ;;  %2568 = vmatprep.subr.bf16.mxu1 %v3707_v35  ;;  %v3788_v34 = vld [vmem:[#allocation9 + $0x564] ss:$16 sps:$4 sm:$0xff]   ;;  %v3791_v35 = vld [vmem:[#allocation9 + $0x56c] ss:$16 sps:$4 sm:$0xff]  }
 0x1a3   :  { %2397 = vmatpush1.bf16.msra.mxu0 %v3702_v36  ;;  %2569 = vmatpush1.bf16.msra.mxu1 %v3705_v37  ;;  %v3786_v36 = vld [vmem:[#allocation9 + $0x560] ss:$16 sps:$4 sm:$0xff]   ;;  %v3789_v37 = vld [vmem:[#allocation9 + $0x568] ss:$16 sps:$4 sm:$0xff]  }
 0x1a4   :  { %2398 = vmatprep.subr.bf16.mxu0 %v3710_v38  ;;  %2570 = vmatprep.subr.bf16.mxu1 %v3713_v39  ;;  %v3794_v38 = vld [vmem:[#allocation9 + $0x584] ss:$16 sps:$4 sm:$0xff]   ;;  %v3797_v39 = vld [vmem:[#allocation9 + $0x58c] ss:$16 sps:$4 sm:$0xff]  }
 0x1a7   :  { %2399 = vmatpush1.bf16.msra.mxu0 %v3708_v40  ;;  %2571 = vmatpush1.bf16.msra.mxu1 %v3711_v41  ;;  %v3792_v40 = vld [vmem:[#allocation9 + $0x580] ss:$16 sps:$4 sm:$0xff]   ;;  %v3795_v41 = vld [vmem:[#allocation9 + $0x588] ss:$16 sps:$4 sm:$0xff]  }
 0x1a8   :  { %2400 = vmatprep.subr.bf16.mxu0 %v3716_v42  ;;  %2572 = vmatprep.subr.bf16.mxu1 %v3719_v43  ;;  %v3800_v42 = vld [vmem:[#allocation9 + $0x5a4] ss:$16 sps:$4 sm:$0xff]   ;;  %v3803_v43 = vld [vmem:[#allocation9 + $0x5ac] ss:$16 sps:$4 sm:$0xff]  }
 0x1ab   :  { %2401 = vmatpush1.bf16.msra.mxu0 %v3714_v6  ;;  %2573 = vmatpush1.bf16.msra.mxu1 %v3717_v44  ;;  %v3798_v6 = vld [vmem:[#allocation9 + $0x5a0] ss:$16 sps:$4 sm:$0xff]   ;;  %v3801_v44 = vld [vmem:[#allocation9 + $0x5a8] ss:$16 sps:$4 sm:$0xff]  }
 0x1ac   :  { %2413 = vmatprep.subr.bf16.mxu0 %v3722_v45  ;;  %2585 = vmatprep.subr.bf16.mxu1 %v3725_v46  ;;  %v3806_v45 = vld [vmem:[#allocation9 + $0x5c4] ss:$16 sps:$4 sm:$0xff]   ;;  %v3809_v46 = vld [vmem:[#allocation9 + $0x5cc] ss:$16 sps:$4 sm:$0xff]  }
 0x1ae   :  { %2403 = vmatmul.mubr.bf16.vlgmr.msra.gmra.mrb[8].mxu0 %v4273_v59  ;;  %2575 = vmatmul.mubr.bf16.vlgmr.msra.gmra.mrb[8].mxu1 %v4273_v59  ;;  %v3743_v59 = vld [vmem:[#allocation9 + $0x46c] ss:$16 sps:$4 sm:$0xff]  }
 0x1af   :  { %2414 = vmatpush1.bf16.msra.mxu0 %v3720_v47  ;;  %2586 = vmatpush1.bf16.msra.mxu1 %v3723_v48  ;;  %v3804_v47 = vld [vmem:[#allocation9 + $0x5c0] ss:$16 sps:$4 sm:$0xff]   ;;  %v3807_v48 = vld [vmem:[#allocation9 + $0x5c8] ss:$16 sps:$4 sm:$0xff]  }
 0x1b0   :  { %2415 = vmatprep.subr.bf16.mxu0 %v3728_v49  ;;  %2587 = vmatprep.subr.bf16.mxu1 %v3731_v50  ;;  %v3812_v49 = vld [vmem:[#allocation9 + $0x5e4] ss:$16 sps:$4 sm:$0xff]   ;;  %v3815_v50 = vld [vmem:[#allocation9 + $0x5ec] ss:$16 sps:$4 sm:$0xff]  }
 0x1b1   :  { %2445 = vmatprep.mubr.bf16.mxu0 %v4290_v61  ;;  %2617 = vmatprep.mubr.bf16.mxu1 %v4290_v61  ;;  %v3747_v61 = vld [vmem:[#allocation9 + $0x488] ss:$16 sps:$4 sm:$0xff]  }
 0x1b3   :  { %2416 = vmatpush1.bf16.msra.mxu0 %v3726_v51  ;;  %2588 = vmatpush1.bf16.msra.mxu1 %v3729_v52  ;;  %v3810_v51 = vld [vmem:[#allocation9 + $0x5e0] ss:$16 sps:$4 sm:$0xff]   ;;  %v3813_v52 = vld [vmem:[#allocation9 + $0x5e8] ss:$16 sps:$4 sm:$0xff]  }
 0x1b4   :  { %2417 = vmatprep.subr.bf16.mxu0 %v3734_v11  ;;  %2589 = vmatprep.subr.bf16.mxu1 %v3737_v53  ;;  %v3818_v11 = vld [vmem:[#allocation9 + $0x604] ss:$16 sps:$4 sm:$0xff]   ;;  %v3821_v53 = vld [vmem:[#allocation9 + $0x60c] ss:$16 sps:$4 sm:$0xff]  }
 0x1b7   :  { %2418 = vmatpush1.bf16.msra.mxu0 %v3732_v55  ;;  %2590 = vmatpush1.bf16.msra.mxu1 %v3735_v56  ;;  %v3816_v55 = vld [vmem:[#allocation9 + $0x600] ss:$16 sps:$4 sm:$0xff]   ;;  %v3819_v56 = vld [vmem:[#allocation9 + $0x608] ss:$16 sps:$4 sm:$0xff]  }
 0x1b8   :  { %2419 = vmatprep.subr.bf16.mxu0 %v3740_v57  ;;  %2591 = vmatprep.subr.bf16.mxu1 %v3743_v59  ;;  %v3824_v57 = vld [vmem:[#allocation9 + $0x624] ss:$16 sps:$4 sm:$0xff]   ;;  %v3827_v59 = vld [vmem:[#allocation9 + $0x62c] ss:$16 sps:$4 sm:$0xff]  }
 0x1bb   :  { %2420 = vmatpush1.bf16.msra.mxu0 %v3738_v58  ;;  %2592 = vmatpush1.bf16.msra.mxu1 %v3741_v60  ;;  %v3822_v58 = vld [vmem:[#allocation9 + $0x620] ss:$16 sps:$4 sm:$0xff]   ;;  %v3825_v60 = vld [vmem:[#allocation9 + $0x628] ss:$16 sps:$4 sm:$0xff]  }
 0x1bc   :  { %2421 = vmatprep.subr.bf16.mxu0 %v3746_v62  ;;  %2593 = vmatprep.subr.bf16.mxu1 %v3749_v63  ;;  %v3830_v62 = vld [vmem:[#allocation9 + $0x644] ss:$16 sps:$4 sm:$0xff]   ;;  %v3833_v63 = vld [vmem:[#allocation9 + $0x64c] ss:$16 sps:$4 sm:$0xff]  }
 0x1bf   :  { %2422 = vmatpush1.bf16.msra.mxu0 %v3744_v0  ;;  %2594 = vmatpush1.bf16.msra.mxu1 %v3747_v61  ;;  %v3828_v0 = vld [vmem:[#allocation9 + $0x640] ss:$16 sps:$4 sm:$0xff]   ;;  %v3831_v61 = vld [vmem:[#allocation9 + $0x648] ss:$16 sps:$4 sm:$0xff]  }
 0x1c0   :  { %2423 = vmatprep.subr.bf16.mxu0 %v3752_v1  ;;  %2595 = vmatprep.subr.bf16.mxu1 %v3755_v2  ;;  %v3836_v1 = vld [vmem:[#allocation9 + $0x664] ss:$16 sps:$4 sm:$0xff]   ;;  %v3834_v2 = vld [vmem:[#allocation9 + $0x660] ss:$16 sps:$4 sm:$0xff]  }
 0x1c3   :  { %2424 = vmatpush1.bf16.msra.mxu0 %v3750_v3  ;;  %2596 = vmatpush1.bf16.msra.mxu1 %v3753_v4  ;;  %v3837_v3 = vld [vmem:[#allocation9 + $0x668] ss:$16 sps:$4 sm:$0xff]   ;;  %v3842_v4 = vld [vmem:[#allocation9 + $0x684] ss:$16 sps:$4 sm:$0xff]  }
 0x1c4   :  { %2425 = vmatprep.subr.bf16.mxu0 %v3758_v5  ;;  %2597 = vmatprep.subr.bf16.mxu1 %v3761_v8  ;;  %v3845_v5 = vld [vmem:[#allocation9 + $0x68c] ss:$16 sps:$4 sm:$0xff]   ;;  %v3840_v8 = vld [vmem:[#allocation9 + $0x680] ss:$16 sps:$4 sm:$0xff]  }
 0x1c7   :  { %2426 = vmatpush1.bf16.msra.mxu0 %v3756_v13  ;;  %2598 = vmatpush1.bf16.msra.mxu1 %v3759_v14  ;;  %v3848_v13 = vld [vmem:[#allocation9 + $0x6a4] ss:$16 sps:$4 sm:$0xff]   ;;  %v3851_v14 = vld [vmem:[#allocation9 + $0x6ac] ss:$16 sps:$4 sm:$0xff]  }
 0x1c8   :  { %2427 = vmatprep.subr.bf16.mxu0 %v3764_v16  ;;  %2599 = vmatprep.subr.bf16.mxu1 %v3767_v19  ;;  %v3846_v16 = vld [vmem:[#allocation9 + $0x6a0] ss:$16 sps:$4 sm:$0xff]   ;;  %v3849_v19 = vld [vmem:[#allocation9 + $0x6a8] ss:$16 sps:$4 sm:$0xff]  }
 0x1cb   :  { %2428 = vmatpush1.bf16.msra.mxu0 %v3762_v20  ;;  %2600 = vmatpush1.bf16.msra.mxu1 %v3765_v21  ;;  %v3854_v20 = vld [vmem:[#allocation9 + $0x6c4] ss:$16 sps:$4 sm:$0xff]   ;;  %v3857_v21 = vld [vmem:[#allocation9 + $0x6cc] ss:$16 sps:$4 sm:$0xff]  }
 0x1cc   :  { %2429 = vmatprep.subr.bf16.mxu0 %v3770_v22  ;;  %2601 = vmatprep.subr.bf16.mxu1 %v3773_v24  ;;  %v3852_v22 = vld [vmem:[#allocation9 + $0x6c0] ss:$16 sps:$4 sm:$0xff]   ;;  %v3855_v24 = vld [vmem:[#allocation9 + $0x6c8] ss:$16 sps:$4 sm:$0xff]  }
 0x1cf   :  { %2430 = vmatpush1.bf16.msra.mxu0 %v3768_v7  ;;  %2602 = vmatpush1.bf16.msra.mxu1 %v3771_v26  ;;  %v3860_v7 = vld [vmem:[#allocation9 + $0x6e4] ss:$16 sps:$4 sm:$0xff]   ;;  %v3863_v26 = vld [vmem:[#allocation9 + $0x6ec] ss:$16 sps:$4 sm:$0xff]  }
 0x1d0   :  { %2431 = vmatprep.subr.bf16.mxu0 %v3776_v17  ;;  %2603 = vmatprep.subr.bf16.mxu1 %v3779_v27  ;;  %v3858_v17 = vld [vmem:[#allocation9 + $0x6e0] ss:$16 sps:$4 sm:$0xff]   ;;  %v3861_v27 = vld [vmem:[#allocation9 + $0x6e8] ss:$16 sps:$4 sm:$0xff]  }
 0x1d3   :  { %2432 = vmatpush1.bf16.msra.mxu0 %v3774_v28  ;;  %2604 = vmatpush1.bf16.msra.mxu1 %v3777_v29  ;;  %v3866_v28 = vld [vmem:[#allocation9 + $0x704] ss:$16 sps:$4 sm:$0xff]   ;;  %v3869_v29 = vld [vmem:[#allocation9 + $0x70c] ss:$16 sps:$4 sm:$0xff]  }
 0x1d4   :  { %2433 = vmatprep.subr.bf16.mxu0 %v3782_v30  ;;  %2605 = vmatprep.subr.bf16.mxu1 %v3785_v31  ;;  %v3864_v30 = vld [vmem:[#allocation9 + $0x700] ss:$16 sps:$4 sm:$0xff]   ;;  %v3867_v31 = vld [vmem:[#allocation9 + $0x708] ss:$16 sps:$4 sm:$0xff]  }
 0x1d7   :  { %2434 = vmatpush1.bf16.msra.mxu0 %v3780_v32  ;;  %2606 = vmatpush1.bf16.msra.mxu1 %v3783_v33  ;;  %v3872_v32 = vld [vmem:[#allocation9 + $0x724] ss:$16 sps:$4 sm:$0xff]   ;;  %v3875_v33 = vld [vmem:[#allocation9 + $0x72c] ss:$16 sps:$4 sm:$0xff]  }
 0x1d8   :  { %2435 = vmatprep.subr.bf16.mxu0 %v3788_v34  ;;  %2607 = vmatprep.subr.bf16.mxu1 %v3791_v35  ;;  %v3870_v34 = vld [vmem:[#allocation9 + $0x720] ss:$16 sps:$4 sm:$0xff]   ;;  %v3873_v35 = vld [vmem:[#allocation9 + $0x728] ss:$16 sps:$4 sm:$0xff]  }
 0x1db   :  { %2436 = vmatpush1.bf16.msra.mxu0 %v3786_v36  ;;  %2608 = vmatpush1.bf16.msra.mxu1 %v3789_v37  ;;  %v3878_v36 = vld [vmem:[#allocation9 + $0x744] ss:$16 sps:$4 sm:$0xff]   ;;  %v3881_v37 = vld [vmem:[#allocation9 + $0x74c] ss:$16 sps:$4 sm:$0xff]  }
 0x1dc   :  { %2437 = vmatprep.subr.bf16.mxu0 %v3794_v38  ;;  %2609 = vmatprep.subr.bf16.mxu1 %v3797_v39  ;;  %v3876_v38 = vld [vmem:[#allocation9 + $0x740] ss:$16 sps:$4 sm:$0xff]   ;;  %v3879_v39 = vld [vmem:[#allocation9 + $0x748] ss:$16 sps:$4 sm:$0xff]  }
 0x1df   :  { %2438 = vmatpush1.bf16.msra.mxu0 %v3792_v40  ;;  %2610 = vmatpush1.bf16.msra.mxu1 %v3795_v41  ;;  %v3884_v40 = vld [vmem:[#allocation9 + $0x764] ss:$16 sps:$4 sm:$0xff]   ;;  %v3887_v41 = vld [vmem:[#allocation9 + $0x76c] ss:$16 sps:$4 sm:$0xff]  }
 0x1e0   :  { %2439 = vmatprep.subr.bf16.mxu0 %v3800_v42  ;;  %2611 = vmatprep.subr.bf16.mxu1 %v3803_v43  ;;  %v3882_v42 = vld [vmem:[#allocation9 + $0x760] ss:$16 sps:$4 sm:$0xff]   ;;  %v3885_v43 = vld [vmem:[#allocation9 + $0x768] ss:$16 sps:$4 sm:$0xff]  }
 0x1e3   :  { %2440 = vmatpush1.bf16.msra.mxu0 %v3798_v6  ;;  %2612 = vmatpush1.bf16.msra.mxu1 %v3801_v44  ;;  %v3890_v6 = vld [vmem:[#allocation9 + $0x784] ss:$16 sps:$4 sm:$0xff]   ;;  %v3893_v44 = vld [vmem:[#allocation9 + $0x78c] ss:$16 sps:$4 sm:$0xff]  }
 0x1e4   :  { %2441 = vmatprep.subr.bf16.mxu0 %v3806_v45  ;;  %2613 = vmatprep.subr.bf16.mxu1 %v3809_v46  ;;  %v3888_v45 = vld [vmem:[#allocation9 + $0x780] ss:$16 sps:$4 sm:$0xff]   ;;  %v3891_v46 = vld [vmem:[#allocation9 + $0x788] ss:$16 sps:$4 sm:$0xff]  }
 0x1e7   :  { %2442 = vmatpush1.bf16.msra.mxu0 %v3804_v47  ;;  %2614 = vmatpush1.bf16.msra.mxu1 %v3807_v48  ;;  %v3896_v47 = vld [vmem:[#allocation9 + $0x7a4] ss:$16 sps:$4 sm:$0xff]   ;;  %v3899_v48 = vld [vmem:[#allocation9 + $0x7ac] ss:$16 sps:$4 sm:$0xff]  }
 0x1e8   :  { %2443 = vmatprep.subr.bf16.mxu0 %v3812_v49  ;;  %2615 = vmatprep.subr.bf16.mxu1 %v3815_v50  ;;  %v3894_v49 = vld [vmem:[#allocation9 + $0x7a0] ss:$16 sps:$4 sm:$0xff]   ;;  %v3897_v50 = vld [vmem:[#allocation9 + $0x7a8] ss:$16 sps:$4 sm:$0xff]  }
 0x1eb   :  { %2444 = vmatpush1.bf16.msra.mxu0 %v3810_v51  ;;  %2616 = vmatpush1.bf16.msra.mxu1 %v3813_v52  ;;  %v3902_v51 = vld [vmem:[#allocation9 + $0x7c4] ss:$16 sps:$4 sm:$0xff]   ;;  %v3905_v52 = vld [vmem:[#allocation9 + $0x7cc] ss:$16 sps:$4 sm:$0xff]  }
 0x1ec   :  { %2456 = vmatprep.subr.bf16.mxu0 %v3818_v11  ;;  %2628 = vmatprep.subr.bf16.mxu1 %v3821_v53  ;;  %v3900_v11 = vld [vmem:[#allocation9 + $0x7c0] ss:$16 sps:$4 sm:$0xff]   ;;  %v3903_v53 = vld [vmem:[#allocation9 + $0x7c8] ss:$16 sps:$4 sm:$0xff]  }
 0x1ee   :  { %2446 = vmatmul.mubr.bf16.vlgmr.msra.gmra.mrb[8].mxu0 %v4288_v54  ;;  %2618 = vmatmul.mubr.bf16.vlgmr.msra.gmra.mrb[8].mxu1 %v4288_v54  ;;  %v3839_v54 = vld [vmem:[#allocation9 + $0x66c] ss:$16 sps:$4 sm:$0xff]  }
 0x1ef   :  { %2457 = vmatpush1.bf16.msra.mxu0 %v3816_v55  ;;  %2629 = vmatpush1.bf16.msra.mxu1 %v3819_v56  ;;  %v3908_v55 = vld [vmem:[#allocation9 + $0x7e4] ss:$16 sps:$4 sm:$0xff]   ;;  %v3911_v56 = vld [vmem:[#allocation9 + $0x7ec] ss:$16 sps:$4 sm:$0xff]  }
 0x1f0   :  { %2458 = vmatprep.subr.bf16.mxu0 %v3824_v57  ;;  %2630 = vmatprep.subr.bf16.mxu1 %v3827_v59  ;;  %v3906_v57 = vld [vmem:[#allocation9 + $0x7e0] ss:$16 sps:$4 sm:$0xff]   ;;  %v3909_v59 = vld [vmem:[#allocation9 + $0x7e8] ss:$16 sps:$4 sm:$0xff]  }
 0x1f1   :  { %2488 = vmatprep.mubr.bf16.mxu0 %v4298_v25  ;;  %2660 = vmatprep.mubr.bf16.mxu1 %v4298_v25  ;;  %v3843_v25 = vld [vmem:[#allocation9 + $0x688] ss:$16 sps:$4 sm:$0xff]  }
 0x1f3   :  { %2459 = vmatpush1.bf16.msra.mxu0 %v3822_v58  ;;  %2631 = vmatpush1.bf16.msra.mxu1 %v3825_v60  ;;  %v3912_v58 = vld [vmem:[#allocation11 + $0x40] sm:$0xff]  }
 0x1f4   :  { %2460 = vmatprep.subr.bf16.mxu0 %v3830_v62  ;;  %2632 = vmatprep.subr.bf16.mxu1 %v3833_v63  ;;  %v3913_v60 = vld [vmem:[#allocation11 + $0xc0] sm:$0xff]  }
 0x1f5   :  { %v3914_v62 = vld [vmem:[#allocation11] sm:$0xff]  }
 0x1f6   :  { %v3915_v63 = vld [vmem:[#allocation11 + $0x80] sm:$0xff]  }
 0x1f7   :  { %2461 = vmatpush1.bf16.msra.mxu0 %v3828_v0  ;;  %2633 = vmatpush1.bf16.msra.mxu1 %v3831_v61  ;;  %v3916_v0 = vld [vmem:[#allocation11 + $0x48] sm:$0xff]  }
 0x1f8   :  { %2462 = vmatprep.subr.bf16.mxu0 %v3836_v1  ;;  %2634 = vmatprep.subr.bf16.mxu1 %v3839_v54  ;;  %v3917_v61 = vld [vmem:[#allocation11 + $0xc8] sm:$0xff]  }
 0x1f9   :  { %v3918_v1 = vld [vmem:[#allocation11 + $0x8] sm:$0xff]  }
 0x1fa   :  { %v3919_v54 = vld [vmem:[#allocation11 + $0x88] sm:$0xff]  }
 0x1fb   :  { %2463 = vmatpush1.bf16.msra.mxu0 %v3834_v2  ;;  %2635 = vmatpush1.bf16.msra.mxu1 %v3837_v3  ;;  %v3920_v2 = vld [vmem:[#allocation11 + $0x50] sm:$0xff]  }
 0x1fc   :  { %2464 = vmatprep.subr.bf16.mxu0 %v3842_v4  ;;  %2636 = vmatprep.subr.bf16.mxu1 %v3845_v5  ;;  %v3921_v3 = vld [vmem:[#allocation11 + $0xd0] sm:$0xff]  }
 0x1fd   :  { %v3922_v4 = vld [vmem:[#allocation11 + $0x10] sm:$0xff]  }
 0x1fe   :  { %v3923_v5 = vld [vmem:[#allocation11 + $0x90] sm:$0xff]  }
 0x1ff   :  { %2465 = vmatpush1.bf16.msra.mxu0 %v3840_v8  ;;  %2637 = vmatpush1.bf16.msra.mxu1 %v3843_v25  ;;  %v3924_v8 = vld [vmem:[#allocation11 + $0x58] sm:$0xff]  }
 0x200   :  { %2466 = vmatprep.subr.bf16.mxu0 %v3848_v13  ;;  %2638 = vmatprep.subr.bf16.mxu1 %v3851_v14  ;;  %v3925_v25 = vld [vmem:[#allocation11 + $0xd8] sm:$0xff]   ;;  %v3928_v14 = vld [vmem:[#allocation11 + $0x60] sm:$0xff]  }
 0x201   :  { %v3926_v13 = vld [vmem:[#allocation11 + $0x18] sm:$0xff]  }
 0x203   :  { %2467 = vmatpush1.bf16.msra.mxu0 %v3846_v16  ;;  %2639 = vmatpush1.bf16.msra.mxu1 %v3849_v19  ;;  %v3929_v16 = vld [vmem:[#allocation11 + $0xe0] sm:$0xff]  }
 0x204   :  { %2468 = vmatprep.subr.bf16.mxu0 %v3854_v20  ;;  %2640 = vmatprep.subr.bf16.mxu1 %v3857_v21  ;;  %v3930_v19 = vld [vmem:[#allocation11 + $0x20] sm:$0xff]   ;;  %v3932_v21 = vld [vmem:[#allocation11 + $0x68] sm:$0xff]  }
 0x205   :  { %v3931_v20 = vld [vmem:[#allocation11 + $0xa0] sm:$0xff]  }
 0x207   :  { %2469 = vmatpush1.bf16.msra.mxu0 %v3852_v22  ;;  %2641 = vmatpush1.bf16.msra.mxu1 %v3855_v24  ;;  %v3933_v22 = vld [vmem:[#allocation11 + $0xe8] sm:$0xff]  }
 0x208   :  { %2470 = vmatprep.subr.bf16.mxu0 %v3860_v7  ;;  %2642 = vmatprep.subr.bf16.mxu1 %v3863_v26  ;;  %v3934_v24 = vld [vmem:[#allocation11 + $0x28] sm:$0xff]   ;;  %v3936_v26 = vld [vmem:[#allocation11 + $0x70] sm:$0xff]  }
 0x209   :  { %v3935_v7 = vld [vmem:[#allocation11 + $0xa8] sm:$0xff]  }
 0x20b   :  { %2471 = vmatpush1.bf16.msra.mxu0 %v3858_v17  ;;  %2643 = vmatpush1.bf16.msra.mxu1 %v3861_v27  ;;  %v3937_v17 = vld [vmem:[#allocation11 + $0xf0] sm:$0xff]  }
 0x20c   :  { %2472 = vmatprep.subr.bf16.mxu0 %v3866_v28  ;;  %2644 = vmatprep.subr.bf16.mxu1 %v3869_v29  ;;  %v3938_v27 = vld [vmem:[#allocation11 + $0x30] sm:$0xff]   ;;  %v3940_v29 = vld [vmem:[#allocation11 + $0x78] sm:$0xff]  }
 0x20d   :  { %v3939_v28 = vld [vmem:[#allocation11 + $0xb0] sm:$0xff]  }
 0x20f   :  { %2473 = vmatpush1.bf16.msra.mxu0 %v3864_v30  ;;  %2645 = vmatpush1.bf16.msra.mxu1 %v3867_v31  ;;  %v3941_v30 = vld [vmem:[#allocation11 + $0xf8] sm:$0xff]  }
 0x210   :  { %2474 = vmatprep.subr.bf16.mxu0 %v3872_v32  ;;  %2646 = vmatprep.subr.bf16.mxu1 %v3875_v33  ;;  %v3942_v31 = vld [vmem:[#allocation11 + $0x38] sm:$0xff]   ;;  %v1025_v33 = vld [vmem:[%s4345_s4] sm:$0xf] }
 0x211   :  { %v3943_v32 = vld [vmem:[#allocation11 + $0xb8] sm:$0xff]  }
 0x213   :  { %2475 = vmatpush1.bf16.msra.mxu0 %v3870_v34  ;;  %2647 = vmatpush1.bf16.msra.mxu1 %v3873_v35  ;;  %v1030_v34 = vrot.slane %v1025_v33, %v181_v10  ;;  %v1038_v35 = vrot.slane %v1025_v33, %v189_v15 }
 0x214   :  { %2476 = vmatprep.subr.bf16.mxu0 %v3878_v36  ;;  %2648 = vmatprep.subr.bf16.mxu1 %v3881_v37  ;;  %v1034_v36 = vrot.slane %v1025_v33, %v185_v12  ;;  %v1042_v37 = vrot.slane %v1025_v33, %v193_v18 }
 0x217   :  { %2477 = vmatpush1.bf16.msra.mxu0 %v3876_v38  ;;  %2649 = vmatpush1.bf16.msra.mxu1 %v3879_v39  ;;  %v2680_v39 = vstv %s3400_s26 }
 0x218   :  { %2478 = vmatprep.subr.bf16.mxu0 %v3884_v40  ;;  %2650 = vmatprep.subr.bf16.mxu1 %v3887_v41 }
 0x21b   :  { %2479 = vmatpush1.bf16.msra.mxu0 %v3882_v42  ;;  %2651 = vmatpush1.bf16.msra.mxu1 %v3885_v43 }
 0x21c   :  { %2480 = vmatprep.subr.bf16.mxu0 %v3890_v6  ;;  %2652 = vmatprep.subr.bf16.mxu1 %v3893_v44 }
 0x21f   :  { %2481 = vmatpush1.bf16.msra.mxu0 %v3888_v45  ;;  %2653 = vmatpush1.bf16.msra.mxu1 %v3891_v46 }
 0x220   :  { %2482 = vmatprep.subr.bf16.mxu0 %v3896_v47  ;;  %2654 = vmatprep.subr.bf16.mxu1 %v3899_v48 }
 0x223   :  { %2483 = vmatpush1.bf16.msra.mxu0 %v3894_v49  ;;  %2655 = vmatpush1.bf16.msra.mxu1 %v3897_v50 }
 0x224   :  { %2484 = vmatprep.subr.bf16.mxu0 %v3902_v51  ;;  %2656 = vmatprep.subr.bf16.mxu1 %v3905_v52 }
 0x227   :  { %2485 = vmatpush1.bf16.msra.mxu0 %v3900_v11  ;;  %2657 = vmatpush1.bf16.msra.mxu1 %v3903_v53 }
 0x228   :  { %2486 = vmatprep.subr.bf16.mxu0 %v3908_v55  ;;  %2658 = vmatprep.subr.bf16.mxu1 %v3911_v56 }
 0x22b   :  { %2487 = vmatpush1.bf16.msra.mxu0 %v3906_v57  ;;  %2659 = vmatpush1.bf16.msra.mxu1 %v3909_v59 }
 0x22c   :  { %3436 = vmatprep.subr.bf16.mxu0 %v3912_v58  ;;  %3458 = vmatprep.subr.bf16.mxu1 %v3913_v60 }
 0x22e   :  { %2489 = vmatmul.mubr.bf16.vlgmr.msra.gmra.mrb[8].mxu0 %v4296_v23  ;;  %2661 = vmatmul.mubr.bf16.vlgmr.msra.gmra.mrb[8].mxu1 %v4296_v23  ;;  %v3927_v23 = vld [vmem:[#allocation11 + $0x98] sm:$0xff]  }
 0x22f   :  { %3437 = vmatpush3.bf16.msra.mxu0 %v3914_v62  ;;  %3459 = vmatpush3.bf16.msra.mxu1 %v3915_v63 }
 0x230   :  { %3438 = vmatprep.subr.bf16.mxu0 %v3916_v0  ;;  %3460 = vmatprep.subr.bf16.mxu1 %v3917_v61 }
 0x233   :  { %3439 = vmatpush3.bf16.msra.mxu0 %v3918_v1  ;;  %3461 = vmatpush3.bf16.msra.mxu1 %v3919_v54 }
 0x234   :  { %3440 = vmatprep.subr.bf16.mxu0 %v3920_v2  ;;  %3462 = vmatprep.subr.bf16.mxu1 %v3921_v3 }
 0x237   :  { %3441 = vmatpush3.bf16.msra.mxu0 %v3922_v4  ;;  %3463 = vmatpush3.bf16.msra.mxu1 %v3923_v5 }
 0x238   :  { %3442 = vmatprep.subr.bf16.mxu0 %v3924_v8  ;;  %3464 = vmatprep.subr.bf16.mxu1 %v3925_v25  ;;  %v3401_v8 = vld [vmem:[%s4347_s6] ss:$0 sm:$0xff]  ;;  %s4121_s6 = smov [#allocation13]  }
 0x239   :  { %s3065_s10 = sshll.u32 %s4121_s6, 4  ;;  %s3066_s10 = int_to_ptr.vmem [resolvable:$true] %s3065_s10 }
 0x23a   :  { %s4074_s0 = scalar_lea.vmem %s3066_s10, 256  ;;  %p4079_p4 = scmp.lt.s32.totalorder %s3066_s10, %s3066_s10 }
 0x23b   :  { %3443 = vmatpush3.bf16.msra.mxu0 %v3926_v13  ;;  %3465 = vmatpush3.bf16.msra.mxu1 %v3927_v23  ;;  %p4075_p3 = scmp.ne.s32.totalorder %s3066_s10, %s4074_s0  ;;  %p4080_p5 = scmp.lt.s32.totalorder %s4074_s0, %s4074_s0 }
 0x23c   :  { %3444 = vmatprep.subr.bf16.mxu0 %v3928_v14  ;;  %3466 = vmatprep.subr.bf16.mxu1 %v3929_v16 }
 0x23d   :  { %p4081_p6 = por %p4080_p5, %p4079_p4 }
 0x23f   :  { %3445 = vmatpush3.bf16.msra.mxu0 %v3930_v19  ;;  %3467 = vmatpush3.bf16.msra.mxu1 %v3931_v20  ;;  %p4082_p7 = pnand %p4081_p6, %p4075_p3 }
 0x240   :  { %3446 = vmatprep.subr.bf16.mxu0 %v3932_v21  ;;  %3468 = vmatprep.subr.bf16.mxu1 %v3933_v22 }
 0x243   :  { %3447 = vmatpush3.bf16.msra.mxu0 %v3934_v24  ;;  %3469 = vmatpush3.bf16.msra.mxu1 %v3935_v7 }
 0x244   :  { %3448 = vmatprep.subr.bf16.mxu0 %v3936_v26  ;;  %3470 = vmatprep.subr.bf16.mxu1 %v3937_v17 }
 0x247   :  { %3449 = vmatpush3.bf16.msra.mxu0 %v3938_v27  ;;  %3471 = vmatpush3.bf16.msra.mxu1 %v3939_v28 }
 0x248   :  { %3450 = vmatprep.subr.bf16.mxu0 %v3940_v29  ;;  %3472 = vmatprep.subr.bf16.mxu1 %v3941_v30 }
 0x24b   :  { %3451 = vmatpush3.bf16.msra.mxu0 %v3942_v31  ;;  %3473 = vmatpush3.bf16.msra.mxu1 %v3943_v32 }
 0x301   :  { %v2490_v38 = vpop.f32.mrb[8].mxu0  ;;  %v2662_v40 = vpop.f32.mrb[8].mxu1 }
 0x302   :  { %v3480_v41 = vadd.f32 %v2490_v38, %v1030_v34  ;;  %v3484_v42 = vadd.f32 %v2662_v40, %v1038_v35  ;;  %v2492_v43 = vpop.f32.mrb[9].mxu0  ;;  %v2664_v6 = vpop.f32.mrb[9].mxu1 }
 0x303   :  { %v3481_v44 = vadd.f32 %v2492_v43, %v1034_v36  ;;  %v3485_v45 = vadd.f32 %v2664_v6, %v1042_v37  ;;  %v2494_v46 = vpop.f32.mrb[10].mxu0  ;;  %v2666_v10 = vpop.f32.mrb[10].mxu1 }
 0x304   :  { %vm2671_vm0 = vcmp.gt.f32.partialorder %v3480_v41, 0.0  ;;  %v2681_v47 = vmul.f32 %v3480_v41, %v2680_v39  ;;  %vm2673_vm1 = vcmp.gt.f32.partialorder %v3484_v42, 0.0  ;;  %v2683_v15 = vmul.f32 %v3484_v42, %v2680_v39  ;;  %v2496_v48 = vpop.f32.mrb[11].mxu0  ;;  %v2668_v12 = vpop.f32.mrb[11].mxu1 }
 0x305   :  { %vm2672_vm2 = vcmp.gt.f32.partialorder %v3481_v44, 0.0  ;;  %v2682_v9 = vmul.f32 %v3481_v44, %v2680_v39  ;;  %vm2674_vm3 = vcmp.gt.f32.partialorder %v3485_v45, 0.0  ;;  %v2684_v18 = vmul.f32 %v3485_v45, %v2680_v39 }
 0x306   :  { %v3482_v49 = vadd.f32 %v2494_v46, %v1030_v34  ;;  %v3486_v50 = vadd.f32 %v2666_v10, %v1038_v35  ;;  %v2689_v51 = vsel %vm2671_vm0, %v3480_v41, %v2681_v47  ;;  %v2691_v52 = vsel %vm2673_vm1, %v3484_v42, %v2683_v15 }
 0x307   :  { %v3483_v11 = vadd.f32 %v2496_v48, %v1034_v36  ;;  %v3487_v53 = vadd.f32 %v2668_v12, %v1042_v37  ;;  %v2690_v62 = vsel %vm2672_vm2, %v3481_v44, %v2682_v9  ;;  %v2692_v63 = vsel %vm2674_vm3, %v3485_v45, %v2684_v18 }
 0x308   :  { %vm2675_vm4 = vcmp.gt.f32.partialorder %v3482_v49, 0.0  ;;  %v2685_v55 = vmul.f32 %v3482_v49, %v2680_v39  ;;  %vm2677_vm5 = vcmp.gt.f32.partialorder %v3486_v50, 0.0  ;;  %v2687_v56 = vmul.f32 %v3486_v50, %v2680_v39 }
 0x309   :  { %vm2676_vm6 = vcmp.gt.f32.partialorder %v3483_v11, 0.0  ;;  %v2686_v57 = vmul.f32 %v3483_v11, %v2680_v39  ;;  %vm2678_vm7 = vcmp.gt.f32.partialorder %v3487_v53, 0.0  ;;  %v2688_v59 = vmul.f32 %v3487_v53, %v2680_v39 }
 0x30a   :  { %v2693_v58 = vsel %vm2675_vm4, %v3482_v49, %v2685_v55  ;;  %v2695_v60 = vsel %vm2677_vm5, %v3486_v50, %v2687_v56 }
 0x30b   :  { %v2697_v0 = vpack.c.bf16 %v2693_v58, %v2689_v51  ;;  %v2699_v61 = vpack.c.bf16 %v2695_v60, %v2691_v52  ;;  %v2694_v1 = vsel %vm2676_vm6, %v3483_v11, %v2686_v57  ;;  %v2696_v54 = vsel %vm2678_vm7, %v3487_v53, %v2688_v59 }
 0x30c   :  { %v2698_v2 = vpack.c.bf16 %v2694_v1, %v2690_v62  ;;  %v2700_v3 = vpack.c.bf16 %v2696_v54, %v2692_v63 }
 0x30e   :  { %2996 = vmatprep.mubr.bf16.mxu0 %v2698_v2  ;;  %3037 = vmatprep.mubr.bf16.mxu1 %v2700_v3 }
 0x30f   :  { %2997 = vmatmul.mubr.bf16.vlgmr.msra.gmra.mrb[12].mxu0 %v2697_v0  ;;  %3038 = vmatmul.mubr.bf16.vlgmr.msra.gmra.mrb[12].mxu1 %v2699_v61 }
 0x3e2   :  { %v3452_v4 = vpop.f32.mrb[12].mxu0  ;;  %v3474_v5 = vpop.f32.mrb[12].mxu1 }
 0x3e3   :  { %v3453_v25 = vpop.f32.mrb[13].mxu0  ;;  %v3475_v13 = vpop.f32.mrb[13].mxu1 }
 0x3e4   :  { %v3454_v23 = vadd.f32 %v3453_v25, %v3452_v4  ;;  %v3476_v14 = vadd.f32 %v3475_v13, %v3474_v5  ;;  %v3455_v16 = vpop.f32.mrb[14].mxu0  ;;  %v3477_v19 = vpop.f32.mrb[14].mxu1 }
 0x3e5   :  { %v3456_v20 = vpop.f32.mrb[15].mxu0  ;;  %v3478_v21 = vpop.f32.mrb[15].mxu1 }
 0x3e6   :  { %v2999_v22 = vadd.f32 %v3454_v23, %v3401_v8  ;;  %v3457_v24 = vadd.f32 %v3456_v20, %v3455_v16  ;;  %v3479_v7 = vadd.f32 %v3478_v21, %v3477_v19 }
 0x3e8   :  { %v3040_v26 = vadd.f32 %v3476_v14, %v2999_v22  ;;  %v3002_v17 = vadd.f32 %v3457_v24, %v3401_v8 }
 0x3ea   :  { %v3434_v27 = vmul.f32 -1.442695, %v3040_v26  ;;  %v3043_v28 = vadd.f32 %v3479_v7, %v3002_v17 }
 0x3ec   :  { %3944 = vpow2.f32 %v3434_v27  ;;  %v3435_v29 = vmul.f32 -1.442695, %v3043_v28 }
 0x3ee   :  { %3946 = vpow2.f32 %v3435_v29 }
 0x3f6   :  { %v3945_v30 = vpop.eup %3944 }
 0x3f7   :  { %v3052_v31 = vadd.f32 1.0, %v3945_v30 }
 0x3f8   :  { %v3947_v32 = vpop.eup %3946 }
 0x3f9   :  { %v3053_v33 = vadd.f32 1.0, %v3947_v32  ;;  %3948 = vrcp.f32 %v3052_v31 }
 0x3fb   :  { %3950 = vrcp.f32 %v3053_v33 }
 0x403   :  { %v3949_v34 = vpop.eup %3948 }
 0x404   :  { %3058 = vst [vmem:[#allocation13] sm:$0xff] %v3949_v34 }
 0x405   :  { %v3951_v35 = vpop.eup %3950 }
 0x406   :  { %3059 = vst [vmem:[#allocation13 + $0x8] sm:$0xff] %v3951_v35 }
 0x407   :  { %4085 = shalt.err (!%p4082_p7)
}
 0x408   :  { %s4086_s13 = scalar_lea.hbm %s4349_s8, 256 }
 0x409   :  { %p4087_p8 = scmp.ne.s32.totalorder %s4349_s8, %s4086_s13  ;;  %p4090_p9 = scmp.lt.u32.totalorder %s4086_s13, %s4349_s8 }
 0x40b   :  { %p4092_p10 = pnand %p4090_p9, %p4087_p8 }
 0x40d   :  { %4095 = shalt.err (!%p4092_p10)
}
 0x40e   :  { %3071 = dma.vmem_to_hbm [thread:$0]  %s3066_s10, 256, %s4349_s8, [#allocation4], %s4113_s3, %s4113_s3, %s4114_s20  }
 0x40f   :  { %4104 = dma.done.wait [#allocation4], 256  }
 0x410   :  { %4105 = vsyncadd [#allocation4], 4294967040 }
 0x411   :  { %3075 = vsyncpa [#allocation3], 1 }
 0x412   :  { %3076 = vsyncpa [#allocation7], 1 }
 0x413   :  { %3077 = vsyncpa [#allocation10], 1 }
 0x414   :  { %3078 = vsyncpa [#allocation4], 1 }
 0x415   :  { %3079 = vsyncpa [#allocation5], 1 }

</bundles_post_ra>
